<compile_context>
chip_gen: v7x
topology: tpu7x:2x2x1
jax: 0.10.0
libtpu: 0.0.40
codegen_flags: <defaults>
</compile_context>

<pallas_src>
import jax
import jax.numpy as jnp
from jax import lax
from jax.experimental import pallas as pl
from jax.experimental.pallas import tpu as pltpu

_LANE = 128


def _round_up(n, m):
    return ((n + m - 1) // m) * m


def _c32(v):
    """Python int -> Python int with int32 two's-complement wrapping.

    Kept as a *Python* int so it lowers as a jaxpr literal inside the kernel
    (jax-array constants in the kernel closure are rejected by pallas_call).
    """
    v &= 0xFFFFFFFF
    return v - (1 << 32) if v >= 0x80000000 else v


def _srl(x, s):
    """Logical right shift of an int32 array by a static amount (shift + mask)."""
    return (x >> s) & ((1 << (32 - s)) - 1)


def _mix(x):
    """lowbias32 finishing mixer — int32 VPU ops only (TPU + interpret safe)."""
    x = x ^ _srl(x, 16)
    x = x * _c32(0x7FEB352D)
    x = x ^ _srl(x, 15)
    x = x * _c32(0x846CA68B)
    x = x ^ _srl(x, 16)
    return x


def _make_kernel(num_hidden_layers, dropout_prob, training, matmul_dtype,
                 use_hw_prng):
    apply_dropout = training and dropout_prob > 0.0
    keep_scale = (1.0 / (1.0 - dropout_prob)) if dropout_prob < 1.0 else 0.0
    # keep iff top-24 random bits >= threshold  ->  P(keep) = 1 - p (int compare only)
    threshold_24 = min(int(round(dropout_prob * (1 << 24))), 1 << 24)  # Python int
    # f32 path: full-precision MXU passes so eval-mode parity holds at any width.
    precision = lax.Precision.HIGHEST if matmul_dtype == jnp.float32 else None

    def kernel(seed_ref, x_ref, *refs):
        # refs = (w1, b1, w2, b2, ..., w_out, b_out, o_ref)
        o_ref = refs[-1]
        param_refs = refs[:-1]

        base_cache = {}  # iota + affine base mix hoisted out of the layer loop

        if apply_dropout:
            # Independent masks per batch tile / TensorCore and per layer.
            tile_salt = seed_ref[0] * _c32(1000003) + pl.program_id(0) * _c32(7919)
            if use_hw_prng:
                pltpu.prng_seed(seed_ref[0], pl.program_id(0))

        def keep_mask(shape, layer_salt):
            if use_hw_prng:
                bits = pltpu.bitcast(pltpu.prng_random_bits(shape), jnp.int32)
                r24 = _srl(bits, 8)
            else:
                if shape not in base_cache:
                    r = lax.broadcasted_iota(jnp.int32, shape, 0)
                    c = lax.broadcasted_iota(jnp.int32, shape, 1)
                    base_cache[shape] = (r * _c32(0x9E3779B1)
                                         + c * _c32(0x85EBCA77) + tile_salt)
                r24 = _srl(_mix(base_cache[shape] + layer_salt), 8)
            return r24 >= threshold_24

        h = x_ref[...].astype(jnp.float32)

        # hidden layers: Linear -> ReLU -> Dropout
        for li in range(num_hidden_layers):
            w = param_refs[2 * li][...]        # already matmul_dtype (cast in wrapper)
            b = param_refs[2 * li + 1][...]    # f32
            h = jnp.dot(h.astype(matmul_dtype), w,
                        preferred_element_type=jnp.float32, precision=precision)
            h = jnp.maximum(h + b, 0.0)
            if apply_dropout:
                keep = keep_mask(h.shape, _c32((li + 1) * 0x9E3779B1))
                h = jnp.where(keep, h * keep_scale, 0.0)

        # final Linear (no activation / dropout)
        w = param_refs[-2][...]
        b = param_refs[-1][...]
        out = jnp.dot(h.astype(matmul_dtype), w,
                      preferred_element_type=jnp.float32, precision=precision) + b
        o_ref[...] = out.astype(o_ref.dtype)

    return kernel


def mlp_dropout_forward(x, params, *, dropout_prob, seed=0, training=True,
                        matmul_dtype=jnp.float32, tile_b=None, use_hw_prng=False):
    """params: list of (W [in, out], b [out]); last entry is the output layer.

    matmul_dtype=jnp.bfloat16 is the right choice for realistic widths (native
    MXU dtype, half the weight DMA/VMEM); f32 (default) keeps bit-tight eval
    parity for the tiny demo. use_hw_prng=True uses the TPU hardware PRNG for
    dropout masks (real devices only; no interpret-mode lowering).
    """
    B, in_dim = x.shape
    out_dim = params[-1][0].shape[1]
    num_hidden_layers = len(params) - 1

    # Lane-dense padding of every feature dim to a multiple of 128 (exact:
    # zero-padded lanes stay zero through Linear+ReLU+Dropout).
    dims = [in_dim] + [w.shape[1] for (w, _) in params]
    pdims = [_round_up(d, _LANE) for d in dims]

    # Batch tiling: >=2 grid tiles when B allows (so v7x megacore engages with
    # the "parallel" axis); M rounded to 256 when large enough to fill the
    # 2x256x256 MXU on v6e/v7x. Weights stay VMEM-resident across tiles.
    if tile_b is None:
        half = -(-B // 2)
        tile_b = min(512, _round_up(max(half, 8), 8))
        if tile_b >= 256:
            tile_b = _round_up(tile_b, 256)
    b_pad = _round_up(B, tile_b)
    grid = (b_pad // tile_b,)

    wdtype = jnp.dtype(matmul_dtype)
    x_p = jnp.zeros((b_pad, pdims[0]), x.dtype).at[:B, :in_dim].set(x)

    flat_inputs = [x_p]
    in_specs = [pl.BlockSpec((tile_b, pdims[0]), lambda i, seed_ref: (i, 0))]
    for li, (w, b) in enumerate(params):
        p_in, p_out = pdims[li], pdims[li + 1]
        # Pad + cast weights to the MXU dtype once here (not per grid step in-kernel).
        w_p = (jnp.zeros((p_in, p_out), wdtype)
               .at[:w.shape[0], :w.shape[1]].set(w.astype(wdtype)))
        b_p = (jnp.zeros((1, p_out), jnp.float32)
               .at[0, :b.shape[0]].set(b.astype(jnp.float32)))
        flat_inputs += [w_p, b_p]
        # Constant index_map -> grid-invariant blocks (VMEM-resident, no re-fetch).
        in_specs.append(pl.BlockSpec((p_in, p_out), lambda i, seed_ref: (0, 0)))
        in_specs.append(pl.BlockSpec((1, p_out), lambda i, seed_ref: (0, 0)))

    # Explicit scoped-VMEM budget: resident double-buffered weights + IO tiles +
    # a few activation-sized temps, with headroom, capped at 64 MiB (v7x-safe).
    w_bytes = sum(pdims[i] * pdims[i + 1] for i in range(len(params))) * wdtype.itemsize
    b_bytes = sum(pdims[i + 1] for i in range(len(params))) * 4
    io_bytes = tile_b * (pdims[0] + pdims[-1]) * x.dtype.itemsize
    act_bytes = 3 * tile_b * max(pdims) * 4
    vmem_est = 2 * (w_bytes + b_bytes + io_bytes) + act_bytes
    vmem_limit = min(64 << 20, max(16 << 20, int(vmem_est * 1.5)))

    flops = 2 * b_pad * sum(pdims[i] * pdims[i + 1] for i in range(len(params)))
    cost = pl.CostEstimate(
        flops=flops,
        transcendentals=0,
        bytes_accessed=(w_bytes + b_bytes
                        + x_p.size * x_p.dtype.itemsize
                        + b_pad * pdims[-1] * x.dtype.itemsize))

    kernel = _make_kernel(num_hidden_layers, float(dropout_prob), bool(training),
                          matmul_dtype, bool(use_hw_prng))

    out_p = pl.pallas_call(
        kernel,
        out_shape=jax.ShapeDtypeStruct((b_pad, pdims[-1]), x.dtype),
        grid_spec=pltpu.PrefetchScalarGridSpec(
            num_scalar_prefetch=1,
            grid=grid,
            in_specs=in_specs,
            out_specs=pl.BlockSpec((tile_b, pdims[-1]), lambda i, seed_ref: (i, 0)),
        ),
        compiler_params=pltpu.CompilerParams(
            dimension_semantics=("parallel",),
            vmem_limit_bytes=vmem_limit),
        cost_estimate=cost,
    )(jnp.asarray([seed], dtype=jnp.int32), *flat_inputs)

    return out_p[:B, :out_dim]


def init_mlp_params(key, input_dim, width, depth, output_dim):
    """PyTorch-style uniform(-1/sqrt(fan_in), 1/sqrt(fan_in)) init.

    Returns list of (W [in, out], b [out]) — depth hidden layers + 1 output layer.
    """
    dims = [input_dim] + [width] * depth + [output_dim]
    params = []
    for i in range(len(dims) - 1):
        fan_in, fan_out = dims[i], dims[i + 1]
        key, kw, kb = jax.random.split(key, 3)
        bound = 1.0 / jnp.sqrt(jnp.float32(fan_in))
        w = jax.random.uniform(kw, (fan_in, fan_out), jnp.float32, -bound, bound)
        b = jax.random.uniform(kb, (fan_out,), jnp.float32, -bound, bound)
        params.append((w, b))
    return params


if __name__ == "__main__":
    # Module-consistent config: MLP_dropout(input_dim=16, width=32, depth=3,
    # output_dim=8, dropout_prob=0.1), batch=8.
    input_dim, width, depth, output_dim = 16, 32, 3, 8
    dropout_prob = 0.1
    batch = 8

    key = jax.random.PRNGKey(0)
    key, kx = jax.random.split(key)
    x = jax.random.normal(kx, (batch, input_dim), dtype=jnp.float32)
    params = init_mlp_params(key, input_dim, width, depth, output_dim)

    # MC-dropout forward (dropout active) inside the Pallas kernel.
    out = mlp_dropout_forward(x, params, dropout_prob=dropout_prob,
                              seed=1234, training=True)
    out = jax.block_until_ready(out)
    assert out.shape == (batch, output_dim)
    assert bool(jnp.all(jnp.isfinite(out)))

    # Different seeds -> different dropout masks -> different outputs (MC property).
    out2 = jax.block_until_ready(
        mlp_dropout_forward(x, params, dropout_prob=dropout_prob,
                            seed=4321, training=True))
    assert not bool(jnp.allclose(out, out2))

    # Eval mode (dropout off) matches a pure-JAX reference (f32 matmuls).
    out_eval = mlp_dropout_forward(x, params, dropout_prob=dropout_prob,
                                   seed=1234, training=False)
    h = x
    for (w, b) in params[:-1]:
        h = jnp.maximum(h @ w + b, 0.0)
    ref = h @ params[-1][0] + params[-1][1]
    assert bool(jnp.allclose(jax.block_until_ready(out_eval), ref,
                             atol=1e-5, rtol=1e-5))

    # bf16-MXU path (f32 accumulation): the right choice for realistic widths.
    out_bf16 = jax.block_until_ready(
        mlp_dropout_forward(x, params, dropout_prob=dropout_prob,
                            seed=1234, training=True, matmul_dtype=jnp.bfloat16))
    assert bool(jnp.all(jnp.isfinite(out_bf16)))

    print("KERNEL_OK")
</pallas_src>

<mosaic_0001>
module attributes {stable_mosaic.version = 11 : i64} {
  func.func @kernel(%arg0: i32, %arg1: memref<1xi32, #tpu.memory_space<smem>>, %arg2: memref<8x128xf32, #tpu.memory_space<vmem>>, %arg3: memref<128x128xf32, #tpu.memory_space<vmem>>, %arg4: memref<1x128xf32, #tpu.memory_space<vmem>>, %arg5: memref<128x128xf32, #tpu.memory_space<vmem>>, %arg6: memref<1x128xf32, #tpu.memory_space<vmem>>, %arg7: memref<128x128xf32, #tpu.memory_space<vmem>>, %arg8: memref<1x128xf32, #tpu.memory_space<vmem>>, %arg9: memref<128x128xf32, #tpu.memory_space<vmem>>, %arg10: memref<1x128xf32, #tpu.memory_space<vmem>>, %arg11: memref<8x128xf32, #tpu.memory_space<vmem>>) attributes {dimension_semantics = [#tpu.dimension_semantics<parallel>], iteration_bounds = array<i64: 1>, scalar_prefetch = 1 : i64, scratch_operands = 0 : i64, tpu.core_type = #tpu.core_type<tc>, window_params = [{transform_indices = @transform_0, window_bounds = array<i64: 8, 128>}, {pipeline_mode = #tpu.pipeline_mode<synchronous>, transform_indices = @transform_1, window_bounds = array<i64: 128, 128>}, {pipeline_mode = #tpu.pipeline_mode<synchronous>, transform_indices = @transform_2, window_bounds = array<i64: 1, 128>}, {pipeline_mode = #tpu.pipeline_mode<synchronous>, transform_indices = @transform_3, window_bounds = array<i64: 128, 128>}, {pipeline_mode = #tpu.pipeline_mode<synchronous>, transform_indices = @transform_4, window_bounds = array<i64: 1, 128>}, {pipeline_mode = #tpu.pipeline_mode<synchronous>, transform_indices = @transform_5, window_bounds = array<i64: 128, 128>}, {pipeline_mode = #tpu.pipeline_mode<synchronous>, transform_indices = @transform_6, window_bounds = array<i64: 1, 128>}, {pipeline_mode = #tpu.pipeline_mode<synchronous>, transform_indices = @transform_7, window_bounds = array<i64: 128, 128>}, {pipeline_mode = #tpu.pipeline_mode<synchronous>, transform_indices = @transform_8, window_bounds = array<i64: 1, 128>}, {transform_indices = @transform_9, window_bounds = array<i64: 8, 128>}]} {
    %c0 = arith.constant 0 : index
    %0 = memref.load %arg1[%c0] : memref<1xi32, #tpu.memory_space<smem>>
    %c1000003_i32 = arith.constant 1000003 : i32
    %1 = arith.muli %0, %c1000003_i32 : i32
    %c7919_i32 = arith.constant 7919 : i32
    %2 = arith.muli %arg0, %c7919_i32 : i32
    %3 = arith.addi %1, %2 : i32
    %c0_0 = arith.constant 0 : index
    %c0_1 = arith.constant 0 : index
    %4 = vector.load %arg2[%c0_0, %c0_1] : memref<8x128xf32, #tpu.memory_space<vmem>>, vector<8x128xf32>
    %c0_2 = arith.constant 0 : index
    %c0_3 = arith.constant 0 : index
    %5 = vector.load %arg3[%c0_2, %c0_3] : memref<128x128xf32, #tpu.memory_space<vmem>>, vector<128x128xf32>
    %c0_4 = arith.constant 0 : index
    %c0_5 = arith.constant 0 : index
    %6 = vector.load %arg4[%c0_4, %c0_5] : memref<1x128xf32, #tpu.memory_space<vmem>>, vector<1x128xf32>
    %cst = arith.constant dense<0.000000e+00> : vector<8x128xf32>
    %7 = tpu.matmul %4, %5, %cst {dimension_numbers = #tpu.dot_dimension_numbers<[1], [0], [0], [1], [0, 0, 1, 1], [], []>, precision = #tpu.contract_precision<fp32>} : vector<8x128xf32>, vector<128x128xf32>, vector<8x128xf32> -> vector<8x128xf32>
    %8 = vector.broadcast %6 : vector<1x128xf32> to vector<8x128xf32>
    %9 = arith.addf %7, %8 : vector<8x128xf32>
    %cst_6 = arith.constant 0.000000e+00 : f32
    %10 = vector.broadcast %cst_6 : f32 to vector<8x128xf32>
    %11 = arith.maximumf %9, %10 : vector<8x128xf32>
    %12 = tpu.iota {dimensions = array<i32: 0>} : vector<8x128xi32>
    %13 = tpu.iota {dimensions = array<i32: 1>} : vector<8x128xi32>
    %c-1640531535_i32 = arith.constant -1640531535 : i32
    %14 = vector.broadcast %c-1640531535_i32 : i32 to vector<8x128xi32>
    %15 = arith.muli %12, %14 : vector<8x128xi32>
    %c-2048144777_i32 = arith.constant -2048144777 : i32
    %16 = vector.broadcast %c-2048144777_i32 : i32 to vector<8x128xi32>
    %17 = arith.muli %13, %16 : vector<8x128xi32>
    %18 = arith.addi %15, %17 : vector<8x128xi32>
    %19 = vector.broadcast %3 : i32 to vector<8x128xi32>
    %20 = arith.addi %18, %19 : vector<8x128xi32>
    %c-1640531535_i32_7 = arith.constant -1640531535 : i32
    %21 = vector.broadcast %c-1640531535_i32_7 : i32 to vector<8x128xi32>
    %22 = arith.addi %20, %21 : vector<8x128xi32>
    %c16_i32 = arith.constant 16 : i32
    %23 = vector.broadcast %c16_i32 : i32 to vector<8x128xi32>
    %24 = arith.shrsi %22, %23 : vector<8x128xi32>
    %c65535_i32 = arith.constant 65535 : i32
    %25 = vector.broadcast %c65535_i32 : i32 to vector<8x128xi32>
    %26 = arith.andi %24, %25 : vector<8x128xi32>
    %27 = arith.xori %22, %26 : vector<8x128xi32>
    %c2146121005_i32 = arith.constant 2146121005 : i32
    %28 = vector.broadcast %c2146121005_i32 : i32 to vector<8x128xi32>
    %29 = arith.muli %27, %28 : vector<8x128xi32>
    %c15_i32 = arith.constant 15 : i32
    %30 = vector.broadcast %c15_i32 : i32 to vector<8x128xi32>
    %31 = arith.shrsi %29, %30 : vector<8x128xi32>
    %c131071_i32 = arith.constant 131071 : i32
    %32 = vector.broadcast %c131071_i32 : i32 to vector<8x128xi32>
    %33 = arith.andi %31, %32 : vector<8x128xi32>
    %34 = arith.xori %29, %33 : vector<8x128xi32>
    %c-2073254261_i32 = arith.constant -2073254261 : i32
    %35 = vector.broadcast %c-2073254261_i32 : i32 to vector<8x128xi32>
    %36 = arith.muli %34, %35 : vector<8x128xi32>
    %c16_i32_8 = arith.constant 16 : i32
    %37 = vector.broadcast %c16_i32_8 : i32 to vector<8x128xi32>
    %38 = arith.shrsi %36, %37 : vector<8x128xi32>
    %c65535_i32_9 = arith.constant 65535 : i32
    %39 = vector.broadcast %c65535_i32_9 : i32 to vector<8x128xi32>
    %40 = arith.andi %38, %39 : vector<8x128xi32>
    %41 = arith.xori %36, %40 : vector<8x128xi32>
    %c8_i32 = arith.constant 8 : i32
    %42 = vector.broadcast %c8_i32 : i32 to vector<8x128xi32>
    %43 = arith.shrsi %41, %42 : vector<8x128xi32>
    %c16777215_i32 = arith.constant 16777215 : i32
    %44 = vector.broadcast %c16777215_i32 : i32 to vector<8x128xi32>
    %45 = arith.andi %43, %44 : vector<8x128xi32>
    %c1677722_i32 = arith.constant 1677722 : i32
    %46 = vector.broadcast %c1677722_i32 : i32 to vector<8x128xi32>
    %47 = arith.cmpi sge, %45, %46 : vector<8x128xi32>
    %cst_10 = arith.constant 1.11111116 : f32
    %48 = vector.broadcast %cst_10 : f32 to vector<8x128xf32>
    %49 = arith.mulf %11, %48 : vector<8x128xf32>
    %cst_11 = arith.constant 0.000000e+00 : f32
    %50 = vector.broadcast %cst_11 : f32 to vector<8x128xf32>
    %51 = arith.select %47, %49, %50 : vector<8x128xi1>, vector<8x128xf32>
    %c0_12 = arith.constant 0 : index
    %c0_13 = arith.constant 0 : index
    %52 = vector.load %arg5[%c0_12, %c0_13] : memref<128x128xf32, #tpu.memory_space<vmem>>, vector<128x128xf32>
    %c0_14 = arith.constant 0 : index
    %c0_15 = arith.constant 0 : index
    %53 = vector.load %arg6[%c0_14, %c0_15] : memref<1x128xf32, #tpu.memory_space<vmem>>, vector<1x128xf32>
    %cst_16 = arith.constant dense<0.000000e+00> : vector<8x128xf32>
    %54 = tpu.matmul %51, %52, %cst_16 {dimension_numbers = #tpu.dot_dimension_numbers<[1], [0], [0], [1], [0, 0, 1, 1], [], []>, precision = #tpu.contract_precision<fp32>} : vector<8x128xf32>, vector<128x128xf32>, vector<8x128xf32> -> vector<8x128xf32>
    %55 = vector.broadcast %53 : vector<1x128xf32> to vector<8x128xf32>
    %56 = arith.addf %54, %55 : vector<8x128xf32>
    %cst_17 = arith.constant 0.000000e+00 : f32
    %57 = vector.broadcast %cst_17 : f32 to vector<8x128xf32>
    %58 = arith.maximumf %56, %57 : vector<8x128xf32>
    %c1013904226_i32 = arith.constant 1013904226 : i32
    %59 = vector.broadcast %c1013904226_i32 : i32 to vector<8x128xi32>
    %60 = arith.addi %20, %59 : vector<8x128xi32>
    %c16_i32_18 = arith.constant 16 : i32
    %61 = vector.broadcast %c16_i32_18 : i32 to vector<8x128xi32>
    %62 = arith.shrsi %60, %61 : vector<8x128xi32>
    %c65535_i32_19 = arith.constant 65535 : i32
    %63 = vector.broadcast %c65535_i32_19 : i32 to vector<8x128xi32>
    %64 = arith.andi %62, %63 : vector<8x128xi32>
    %65 = arith.xori %60, %64 : vector<8x128xi32>
    %c2146121005_i32_20 = arith.constant 2146121005 : i32
    %66 = vector.broadcast %c2146121005_i32_20 : i32 to vector<8x128xi32>
    %67 = arith.muli %65, %66 : vector<8x128xi32>
    %c15_i32_21 = arith.constant 15 : i32
    %68 = vector.broadcast %c15_i32_21 : i32 to vector<8x128xi32>
    %69 = arith.shrsi %67, %68 : vector<8x128xi32>
    %c131071_i32_22 = arith.constant 131071 : i32
    %70 = vector.broadcast %c131071_i32_22 : i32 to vector<8x128xi32>
    %71 = arith.andi %69, %70 : vector<8x128xi32>
    %72 = arith.xori %67, %71 : vector<8x128xi32>
    %c-2073254261_i32_23 = arith.constant -2073254261 : i32
    %73 = vector.broadcast %c-2073254261_i32_23 : i32 to vector<8x128xi32>
    %74 = arith.muli %72, %73 : vector<8x128xi32>
    %c16_i32_24 = arith.constant 16 : i32
    %75 = vector.broadcast %c16_i32_24 : i32 to vector<8x128xi32>
    %76 = arith.shrsi %74, %75 : vector<8x128xi32>
    %c65535_i32_25 = arith.constant 65535 : i32
    %77 = vector.broadcast %c65535_i32_25 : i32 to vector<8x128xi32>
    %78 = arith.andi %76, %77 : vector<8x128xi32>
    %79 = arith.xori %74, %78 : vector<8x128xi32>
    %c8_i32_26 = arith.constant 8 : i32
    %80 = vector.broadcast %c8_i32_26 : i32 to vector<8x128xi32>
    %81 = arith.shrsi %79, %80 : vector<8x128xi32>
    %c16777215_i32_27 = arith.constant 16777215 : i32
    %82 = vector.broadcast %c16777215_i32_27 : i32 to vector<8x128xi32>
    %83 = arith.andi %81, %82 : vector<8x128xi32>
    %c1677722_i32_28 = arith.constant 1677722 : i32
    %84 = vector.broadcast %c1677722_i32_28 : i32 to vector<8x128xi32>
    %85 = arith.cmpi sge, %83, %84 : vector<8x128xi32>
    %cst_29 = arith.constant 1.11111116 : f32
    %86 = vector.broadcast %cst_29 : f32 to vector<8x128xf32>
    %87 = arith.mulf %58, %86 : vector<8x128xf32>
    %cst_30 = arith.constant 0.000000e+00 : f32
    %88 = vector.broadcast %cst_30 : f32 to vector<8x128xf32>
    %89 = arith.select %85, %87, %88 : vector<8x128xi1>, vector<8x128xf32>
    %c0_31 = arith.constant 0 : index
    %c0_32 = arith.constant 0 : index
    %90 = vector.load %arg7[%c0_31, %c0_32] : memref<128x128xf32, #tpu.memory_space<vmem>>, vector<128x128xf32>
    %c0_33 = arith.constant 0 : index
    %c0_34 = arith.constant 0 : index
    %91 = vector.load %arg8[%c0_33, %c0_34] : memref<1x128xf32, #tpu.memory_space<vmem>>, vector<1x128xf32>
    %cst_35 = arith.constant dense<0.000000e+00> : vector<8x128xf32>
    %92 = tpu.matmul %89, %90, %cst_35 {dimension_numbers = #tpu.dot_dimension_numbers<[1], [0], [0], [1], [0, 0, 1, 1], [], []>, precision = #tpu.contract_precision<fp32>} : vector<8x128xf32>, vector<128x128xf32>, vector<8x128xf32> -> vector<8x128xf32>
    %93 = vector.broadcast %91 : vector<1x128xf32> to vector<8x128xf32>
    %94 = arith.addf %92, %93 : vector<8x128xf32>
    %cst_36 = arith.constant 0.000000e+00 : f32
    %95 = vector.broadcast %cst_36 : f32 to vector<8x128xf32>
    %96 = arith.maximumf %94, %95 : vector<8x128xf32>
    %c-626627309_i32 = arith.constant -626627309 : i32
    %97 = vector.broadcast %c-626627309_i32 : i32 to vector<8x128xi32>
    %98 = arith.addi %20, %97 : vector<8x128xi32>
    %c16_i32_37 = arith.constant 16 : i32
    %99 = vector.broadcast %c16_i32_37 : i32 to vector<8x128xi32>
    %100 = arith.shrsi %98, %99 : vector<8x128xi32>
    %c65535_i32_38 = arith.constant 65535 : i32
    %101 = vector.broadcast %c65535_i32_38 : i32 to vector<8x128xi32>
    %102 = arith.andi %100, %101 : vector<8x128xi32>
    %103 = arith.xori %98, %102 : vector<8x128xi32>
    %c2146121005_i32_39 = arith.constant 2146121005 : i32
    %104 = vector.broadcast %c2146121005_i32_39 : i32 to vector<8x128xi32>
    %105 = arith.muli %103, %104 : vector<8x128xi32>
    %c15_i32_40 = arith.constant 15 : i32
    %106 = vector.broadcast %c15_i32_40 : i32 to vector<8x128xi32>
    %107 = arith.shrsi %105, %106 : vector<8x128xi32>
    %c131071_i32_41 = arith.constant 131071 : i32
    %108 = vector.broadcast %c131071_i32_41 : i32 to vector<8x128xi32>
    %109 = arith.andi %107, %108 : vector<8x128xi32>
    %110 = arith.xori %105, %109 : vector<8x128xi32>
    %c-2073254261_i32_42 = arith.constant -2073254261 : i32
    %111 = vector.broadcast %c-2073254261_i32_42 : i32 to vector<8x128xi32>
    %112 = arith.muli %110, %111 : vector<8x128xi32>
    %c16_i32_43 = arith.constant 16 : i32
    %113 = vector.broadcast %c16_i32_43 : i32 to vector<8x128xi32>
    %114 = arith.shrsi %112, %113 : vector<8x128xi32>
    %c65535_i32_44 = arith.constant 65535 : i32
    %115 = vector.broadcast %c65535_i32_44 : i32 to vector<8x128xi32>
    %116 = arith.andi %114, %115 : vector<8x128xi32>
    %117 = arith.xori %112, %116 : vector<8x128xi32>
    %c8_i32_45 = arith.constant 8 : i32
    %118 = vector.broadcast %c8_i32_45 : i32 to vector<8x128xi32>
    %119 = arith.shrsi %117, %118 : vector<8x128xi32>
    %c16777215_i32_46 = arith.constant 16777215 : i32
    %120 = vector.broadcast %c16777215_i32_46 : i32 to vector<8x128xi32>
    %121 = arith.andi %119, %120 : vector<8x128xi32>
    %c1677722_i32_47 = arith.constant 1677722 : i32
    %122 = vector.broadcast %c1677722_i32_47 : i32 to vector<8x128xi32>
    %123 = arith.cmpi sge, %121, %122 : vector<8x128xi32>
    %cst_48 = arith.constant 1.11111116 : f32
    %124 = vector.broadcast %cst_48 : f32 to vector<8x128xf32>
    %125 = arith.mulf %96, %124 : vector<8x128xf32>
    %cst_49 = arith.constant 0.000000e+00 : f32
    %126 = vector.broadcast %cst_49 : f32 to vector<8x128xf32>
    %127 = arith.select %123, %125, %126 : vector<8x128xi1>, vector<8x128xf32>
    %c0_50 = arith.constant 0 : index
    %c0_51 = arith.constant 0 : index
    %128 = vector.load %arg9[%c0_50, %c0_51] : memref<128x128xf32, #tpu.memory_space<vmem>>, vector<128x128xf32>
    %c0_52 = arith.constant 0 : index
    %c0_53 = arith.constant 0 : index
    %129 = vector.load %arg10[%c0_52, %c0_53] : memref<1x128xf32, #tpu.memory_space<vmem>>, vector<1x128xf32>
    %cst_54 = arith.constant dense<0.000000e+00> : vector<8x128xf32>
    %130 = tpu.matmul %127, %128, %cst_54 {dimension_numbers = #tpu.dot_dimension_numbers<[1], [0], [0], [1], [0, 0, 1, 1], [], []>, precision = #tpu.contract_precision<fp32>} : vector<8x128xf32>, vector<128x128xf32>, vector<8x128xf32> -> vector<8x128xf32>
    %131 = vector.broadcast %129 : vector<1x128xf32> to vector<8x128xf32>
    %132 = arith.addf %130, %131 : vector<8x128xf32>
    %c0_55 = arith.constant 0 : index
    %c0_56 = arith.constant 0 : index
    %133 = vector.load %arg11[%c0_55, %c0_56] : memref<8x128xf32, #tpu.memory_space<vmem>>, vector<8x128xf32>
    tpu.vector_store %arg11[%c0_55, %c0_56], %132 {strides = array<i32>} : memref<8x128xf32, #tpu.memory_space<vmem>>, vector<8x128xf32>,
    return
  }
  func.func @transform_0(%arg0: i32, %arg1: memref<1xi32, #tpu.memory_space<smem>>) -> (i32, i32) {
    %c0_i32 = arith.constant 0 : i32
    %c0_i32_0 = arith.constant 0 : i32
    return %arg0, %c0_i32 : i32, i32
  }
  func.func @transform_1(%arg0: i32, %arg1: memref<1xi32, #tpu.memory_space<smem>>) -> (i32, i32) {
    %c0_i32 = arith.constant 0 : i32
    %c0_i32_0 = arith.constant 0 : i32
    %c0_i32_1 = arith.constant 0 : i32
    return %c0_i32, %c0_i32_0 : i32, i32
  }
  func.func @transform_2(%arg0: i32, %arg1: memref<1xi32, #tpu.memory_space<smem>>) -> (i32, i32) {
    %c0_i32 = arith.constant 0 : i32
    %c0_i32_0 = arith.constant 0 : i32
    %c0_i32_1 = arith.constant 0 : i32
    return %c0_i32, %c0_i32_0 : i32, i32
  }
  func.func @transform_3(%arg0: i32, %arg1: memref<1xi32, #tpu.memory_space<smem>>) -> (i32, i32) {
    %c0_i32 = arith.constant 0 : i32
    %c0_i32_0 = arith.constant 0 : i32
    %c0_i32_1 = arith.constant 0 : i32
    return %c0_i32, %c0_i32_0 : i32, i32
  }
  func.func @transform_4(%arg0: i32, %arg1: memref<1xi32, #tpu.memory_space<smem>>) -> (i32, i32) {
    %c0_i32 = arith.constant 0 : i32
    %c0_i32_0 = arith.constant 0 : i32
    %c0_i32_1 = arith.constant 0 : i32
    return %c0_i32, %c0_i32_0 : i32, i32
  }
  func.func @transform_5(%arg0: i32, %arg1: memref<1xi32, #tpu.memory_space<smem>>) -> (i32, i32) {
    %c0_i32 = arith.constant 0 : i32
    %c0_i32_0 = arith.constant 0 : i32
    %c0_i32_1 = arith.constant 0 : i32
    return %c0_i32, %c0_i32_0 : i32, i32
  }
  func.func @transform_6(%arg0: i32, %arg1: memref<1xi32, #tpu.memory_space<smem>>) -> (i32, i32) {
    %c0_i32 = arith.constant 0 : i32
    %c0_i32_0 = arith.constant 0 : i32
    %c0_i32_1 = arith.constant 0 : i32
    return %c0_i32, %c0_i32_0 : i32, i32
  }
  func.func @transform_7(%arg0: i32, %arg1: memref<1xi32, #tpu.memory_space<smem>>) -> (i32, i32) {
    %c0_i32 = arith.constant 0 : i32
    %c0_i32_0 = arith.constant 0 : i32
    %c0_i32_1 = arith.constant 0 : i32
    return %c0_i32, %c0_i32_0 : i32, i32
  }
  func.func @transform_8(%arg0: i32, %arg1: memref<1xi32, #tpu.memory_space<smem>>) -> (i32, i32) {
    %c0_i32 = arith.constant 0 : i32
    %c0_i32_0 = arith.constant 0 : i32
    %c0_i32_1 = arith.constant 0 : i32
    return %c0_i32, %c0_i32_0 : i32, i32
  }
  func.func @transform_9(%arg0: i32, %arg1: memref<1xi32, #tpu.memory_space<smem>>) -> (i32, i32) {
    %c0_i32 = arith.constant 0 : i32
    %c0_i32_0 = arith.constant 0 : i32
    return %arg0, %c0_i32 : i32, i32
  }
}

</mosaic_0001>

<bundles_post_ra>
// kernel: tpu_custom_call.1
= control target key start
LH: loop header
LB: loop body
LE: loop exit
PB: predicated region body
PF: predicated region fallthrough
CT: control target
= control target key end

     0   :  { %16 = vsyncpa [#allocation5], 0  ;;  %s6119_s0 = inlined_call_operand.<no memory space> [shape: s32[1], index: 0, kind: input, shape index: {}]   ;;  %s6120_s1 = inlined_call_operand.hbm [shape: f32[8,128], index: 1, kind: input, shape index: {}]   ;;  %s6121_s2 = inlined_call_operand.hbm [shape: f32[128,128], index: 2, kind: input, shape index: {}]   ;;  %s6122_s3 = inlined_call_operand.vmem [shape: f32[1,128], index: 3, kind: input, shape index: {}]   ;;  %s6123_s4 = inlined_call_operand.hbm [shape: f32[128,128], index: 4, kind: input, shape index: {}]   ;;  %s6124_s5 = inlined_call_operand.vmem [shape: f32[1,128], index: 5, kind: input, shape index: {}]   ;;  %s6125_s6 = inlined_call_operand.hbm [shape: f32[128,128], index: 6, kind: input, shape index: {}]   ;;  %s6126_s7 = inlined_call_operand.vmem [shape: f32[1,128], index: 7, kind: input, shape index: {}]   ;;  %s6127_s8 = inlined_call_operand.hbm [shape: f32[128,128], index: 8, kind: input, shape index: {}]   ;;  %s6128_s9 = inlined_call_operand.vmem [shape: f32[1,128], index: 9, kind: input, shape index: {}]   ;;  %s6129_s10 = inlined_call_operand.hbm [shape: f32[8,128], index: 10, kind: output, shape index: {}]  }
   0x1   :  { %17 = vsyncpa [#allocation8], 0 }
   0x2   :  { %18 = vsyncpa [#allocation11], 0 }
   0x3   :  { %19 = vsyncpa [#allocation6], 0  ;;  %s4878_s13 = smov [#allocation7]   ;;  %s4738_s17 = scalar_lea.hbm %s6121_s2, 2048 }
   0x4   :  { %s35_s14 = sshll.u32 %s4878_s13, 4  ;;  %p4739_p0 = scmp.ne.s32.totalorder %s6121_s2, %s4738_s17  ;;  %s36_s14 = int_to_ptr.vmem [resolvable:$true] %s35_s14 }
   0x5   :  { %p4742_p1 = scmp.lt.u32.totalorder %s4738_s17, %s6121_s2 }
   0x7   :  { %p4744_p2 = pnand %p4742_p1, %p4739_p0 }
   0x9   :  { %4747 = shalt.err (!%p4744_p2)
}
   0xa   :  { %s4748_s22 = scalar_lea.vmem %s36_s14, 2048  ;;  %p4753_p4 = scmp.lt.s32.totalorder %s36_s14, %s36_s14 }
   0xb   :  { %p4749_p3 = scmp.ne.s32.totalorder %s36_s14, %s4748_s22  ;;  %p4754_p5 = scmp.lt.s32.totalorder %s4748_s22, %s4748_s22 }
   0xd   :  { %p4755_p6 = por %p4754_p5, %p4753_p4 }
   0xf   :  { %p4756_p7 = pnand %p4755_p6, %p4749_p3 }
  0x11   :  { %4759 = shalt.err (!%p4756_p7)
}
  0x12   :  { %s4879_s23 = smov 128   ;;  %s4880_s24 = smov 8  }
  0x13   :  { %41 = dma.hbm_to_vmem [thread:$0]  %s6121_s2, 2048, %s36_s14, [#allocation8], %s4879_s23, %s4879_s23, %s4880_s24  }
  0x14   :  { %s4881_s27 = smov [#allocation10]   ;;  %s4882_s29 = smov [#allocation4]  }
  0x15   :  { %s63_s28 = sshll.u32 %s4881_s27, 4  ;;  %s26_s30 = sshll.u32 %s4882_s29, 4  ;;  %s64_s28 = int_to_ptr.vmem [resolvable:$true] %s63_s28  ;;  %s27_s30 = int_to_ptr.vmem [resolvable:$true] %s26_s30 }
  0x16   :  { %s4760_s13 = scalar_lea.hbm %s6125_s6, 2048 }
  0x17   :  { %p4761_p8 = scmp.ne.s32.totalorder %s6125_s6, %s4760_s13  ;;  %p4764_p9 = scmp.lt.u32.totalorder %s4760_s13, %s6125_s6 }
  0x19   :  { %p4766_p10 = pnand %p4764_p9, %p4761_p8 }
  0x1b   :  { %4769 = shalt.err (!%p4766_p10)
}
  0x1c   :  { %s4770_s2 = scalar_lea.vmem %s64_s28, 2048  ;;  %p4775_p12 = scmp.lt.s32.totalorder %s64_s28, %s64_s28 }
  0x1d   :  { %p4771_p11 = scmp.ne.s32.totalorder %s64_s28, %s4770_s2  ;;  %p4776_p13 = scmp.lt.s32.totalorder %s4770_s2, %s4770_s2 }
  0x1f   :  { %p4777_p0 = por %p4776_p13, %p4775_p12 }
  0x21   :  { %p4778_p1 = pnand %p4777_p0, %p4771_p11 }
  0x23   :  { %4781 = shalt.err (!%p4778_p1)
}
  0x24   :  { %69 = dma.hbm_to_vmem [thread:$0]  %s6125_s6, 2048, %s64_s28, [#allocation11], %s4879_s23, %s4879_s23, %s4880_s24  }
  0x25   :  { %s4782_s22 = scalar_lea.hbm %s6120_s1, 128 }
  0x26   :  { %p4783_p2 = scmp.ne.s32.totalorder %s6120_s1, %s4782_s22  ;;  %p4786_p3 = scmp.lt.u32.totalorder %s4782_s22, %s6120_s1 }
  0x28   :  { %p4788_p4 = pnand %p4786_p3, %p4783_p2 }
  0x2a   :  { %4791 = shalt.err (!%p4788_p4)
}
  0x2b   :  { %s4792_s11 = scalar_lea.vmem %s27_s30, 128  ;;  %p4797_p6 = scmp.lt.s32.totalorder %s27_s30, %s27_s30 }
  0x2c   :  { %p4793_p5 = scmp.ne.s32.totalorder %s27_s30, %s4792_s11  ;;  %p4798_p7 = scmp.lt.s32.totalorder %s4792_s11, %s4792_s11 }
  0x2e   :  { %p4799_p8 = por %p4798_p7, %p4797_p6 }
  0x30   :  { %p4800_p9 = pnand %p4799_p8, %p4793_p5 }
  0x32   :  { %4803 = shalt.err (!%p4800_p9)
}
  0x33   :  { %29 = dma.hbm_to_vmem [thread:$0]  %s6120_s1, 128, %s27_s30, [#allocation5]  }
  0x34   :  { %s4883_s12 = smov [#allocation9]   ;;  %s4884_s15 = smov [#allocation12]  }
  0x35   :  { %s49_s13 = sshll.u32 %s4883_s12, 4  ;;  %s77_s16 = sshll.u32 %s4884_s15, 4  ;;  %s50_s13 = int_to_ptr.vmem [resolvable:$true] %s49_s13  ;;  %s78_s16 = int_to_ptr.vmem [resolvable:$true] %s77_s16 }
  0x36   :  { %s4804_s2 = scalar_lea.hbm %s6123_s4, 2048 }
  0x37   :  { %p4805_p10 = scmp.ne.s32.totalorder %s6123_s4, %s4804_s2  ;;  %p4808_p11 = scmp.lt.u32.totalorder %s4804_s2, %s6123_s4 }
  0x39   :  { %p4810_p12 = pnand %p4808_p11, %p4805_p10 }
  0x3b   :  { %4813 = shalt.err (!%p4810_p12)
}
  0x3c   :  { %s4814_s1 = scalar_lea.vmem %s50_s13, 2048  ;;  %p4819_p0 = scmp.lt.s32.totalorder %s50_s13, %s50_s13 }
  0x3d   :  { %p4815_p13 = scmp.ne.s32.totalorder %s50_s13, %s4814_s1  ;;  %p4820_p1 = scmp.lt.s32.totalorder %s4814_s1, %s4814_s1 }
  0x3f   :  { %p4821_p2 = por %p4820_p1, %p4819_p0 }
  0x41   :  { %p4822_p3 = pnand %p4821_p2, %p4815_p13 }
  0x43   :  { %4825 = shalt.err (!%p4822_p3)
}
  0x44   :  { %55 = dma.hbm_to_vmem [thread:$0]  %s6123_s4, 2048, %s50_s13, [#allocation8], %s4879_s23, %s4879_s23, %s4880_s24  }
  0x45   :  { %s4826_s27 = scalar_lea.hbm %s6127_s8, 2048 }
  0x46   :  { %p4827_p4 = scmp.ne.s32.totalorder %s6127_s8, %s4826_s27  ;;  %p4830_p5 = scmp.lt.u32.totalorder %s4826_s27, %s6127_s8 }
  0x48   :  { %p4832_p6 = pnand %p4830_p5, %p4827_p4 }
  0x4a   :  { %4835 = shalt.err (!%p4832_p6)
}
  0x4b   :  { %s4836_s12 = scalar_lea.vmem %s78_s16, 2048  ;;  %p4841_p8 = scmp.lt.s32.totalorder %s78_s16, %s78_s16 }
  0x4c   :  { %p4837_p7 = scmp.ne.s32.totalorder %s78_s16, %s4836_s12  ;;  %p4842_p9 = scmp.lt.s32.totalorder %s4836_s12, %s4836_s12 }
  0x4e   :  { %p4843_p10 = por %p4842_p9, %p4841_p8 }
  0x50   :  { %p4844_p11 = pnand %p4843_p10, %p4837_p7 }
  0x52   :  { %4847 = shalt.err (!%p4844_p11)
}
  0x53   :  { %83 = dma.hbm_to_vmem [thread:$0]  %s6127_s8, 2048, %s78_s16, [#allocation11], %s4879_s23, %s4879_s23, %s4880_s24  }
  0x54   :  { %4870 = dma.done.wait [#allocation5], 128  }
  0x55   :  { %4871 = vsyncadd [#allocation5], 4294967168 }
  0x56   :  { %4872 = dma.done.wait [#allocation8], 4096  }
  0x57   :  { %4873 = vsyncadd [#allocation8], 4294963200 }
  0x58   :  { %4874 = dma.done.wait [#allocation11], 4096  }
  0x59   :  { %4875 = vsyncadd [#allocation11], 4294963200  ;;  %v4885_v0 = vmov 0.0|0.0   ;;  %vm4886_vm0 = vmmov 0   ;;  %v4887_v1 = vmov 0.0   ;;  %v106_v2 = vld [vmem:[#allocation7] sm:$0xff] }
  0x5a   :  { %4107 = vmatprep.subr.bf16.mxu0 %v4885_v0  ;;  %3299 = vmatprep.mubr.msk.f32.mxu0 %vm4886_vm0, %v4887_v1  ;;  %v107_v3 = vld [vmem:[#allocation7 + $0x8] sm:$0xff]  ;;  %v108_v4 = vld [vmem:[#allocation7 + $0x10] sm:$0xff]  ;;  %v130_v5 = vand.u32 4294901760, %v106_v2  ;;  %v109_v7 = vld [vmem:[#allocation7 + $0x18] sm:$0xff]  ;;  %s102_s24 = smul.u32 1000003, %s6119_s0  ;;  %s4888_s2 = smov [#allocation13]  }
  0x5b   :  { %4251 = vmatprep.subr.bf16.mxu1 %v4885_v0  ;;  %3509 = vmatprep.mubr.msk.f32.mxu1 %vm4886_vm0, %v4887_v1  ;;  %v133_v6 = vand.u32 4294901760, %v107_v3  ;;  %v136_v8 = vand.u32 4294901760, %v108_v4  ;;  %v139_v9 = vand.u32 4294901760, %v109_v7  ;;  %v110_v10 = vld [vmem:[#allocation7 + $0x20] sm:$0xff]  ;;  %v111_v11 = vld [vmem:[#allocation7 + $0x28] sm:$0xff]  ;;  %v112_v16 = vld [vmem:[#allocation7 + $0x30] sm:$0xff] }
  0x5c   :  { %v142_v14 = vand.u32 4294901760, %v110_v10  ;;  %v145_v15 = vand.u32 4294901760, %v111_v11  ;;  %v113_v17 = vld [vmem:[#allocation7 + $0x38] sm:$0xff]  ;;  %v148_v19 = vand.u32 4294901760, %v112_v16  ;;  %v114_v21 = vld [vmem:[#allocation7 + $0x40] sm:$0xff]  ;;  %v115_v22 = vld [vmem:[#allocation7 + $0x48] sm:$0xff]  ;;  %v5032_v24 = vsub.f32 %v106_v2, %v130_v5 }
  0x5d   :  { %v5022_v12 = vpack.c.bf16 %v133_v6, %v130_v5  ;;  %v5025_v13 = vpack.c.bf16 %v139_v9, %v136_v8  ;;  %v151_v20 = vand.u32 4294901760, %v113_v17  ;;  %v105_v23 = vld [vmem:[#allocation4] sm:$0xff]  ;;  %v5034_v25 = vsub.f32 %v107_v3, %v133_v6  ;;  %v116_v29 = vld [vmem:[#allocation7 + $0x50] sm:$0xff]  ;;  %v118_v32 = vld [vmem:[#allocation7 + $0x60] sm:$0xff]  ;;  %s2832_s14 = sshll.u32 %s4888_s2, 4  ;;  %s2833_s14 = int_to_ptr.vmem [resolvable:$true] %s2832_s14 }
  0x5e   :  { %v5029_v18 = vpack.c.bf16 %v145_v15, %v142_v14  ;;  %v154_v27 = vand.u32 4294901760, %v114_v21  ;;  %v157_v28 = vand.u32 4294901760, %v115_v22  ;;  %v117_v30 = vld [vmem:[#allocation7 + $0x58] sm:$0xff]  ;;  %v5040_v31 = vand.u32 4294901760, %v105_v23  ;;  %v119_v35 = vld [vmem:[#allocation7 + $0x68] sm:$0xff]  ;;  %v120_v36 = vld [vmem:[#allocation7 + $0x70] sm:$0xff]  ;;  %p4853_p13 = scmp.lt.s32.totalorder %s2833_s14, %s2833_s14 }
  0x5f   :  { %4109 = vmatpush3.bf16.msra.mxu0 %v5022_v12  ;;  %v5037_v26 = vpack.c.bf16 %v151_v20, %v148_v19  ;;  %v5042_v33 = vsub.f32 %v108_v4, %v136_v8  ;;  %v160_v34 = vand.u32 4294901760, %v116_v29  ;;  %v121_v37 = vld [vmem:[#allocation7 + $0x78] sm:$0xff]  ;;  %v163_v39 = vand.u32 4294901760, %v117_v30  ;;  %s4848_s19 = scalar_lea.vmem %s2833_s14, 128 }
  0x60   :  { %4110 = vmatprep.subr.bf16.mxu0 %v4885_v0  ;;  %v5045_v38 = vpack.c.bf16 %v157_v28, %v154_v27  ;;  %v223_v40 = vand.u32 4294901760, %v5032_v24  ;;  %v230_v41 = vand.u32 4294901760, %v5034_v25  ;;  %v5049_v42 = vsub.f32 %v109_v7, %v139_v9  ;;  %p4849_p12 = scmp.ne.s32.totalorder %s2833_s14, %s4848_s19  ;;  %p4854_p0 = scmp.lt.s32.totalorder %s4848_s19, %s4848_s19 }
  0x61   :  { %v5051_v43 = vsub.f32 %v110_v10, %v142_v14  ;;  %v5053_v44 = vsub.f32 %v111_v11, %v145_v15  ;;  %v5057_v45 = vsub.f32 %v105_v23, %v5040_v31  ;;  %v166_v46 = vand.u32 4294901760, %v118_v32 }
  0x62   :  { %v169_v47 = vand.u32 4294901760, %v119_v35  ;;  %v172_v48 = vand.u32 4294901760, %v120_v36  ;;  %v175_v49 = vand.u32 4294901760, %v121_v37  ;;  %v5059_v50 = vsub.f32 %v112_v16, %v148_v19  ;;  %p4855_p1 = por %p4854_p0, %p4853_p13 }
  0x63   :  { %4112 = vmatpush3.bf16.msra.mxu0 %v5025_v13  ;;  %v5061_v51 = vsub.f32 %v113_v17, %v151_v20  ;;  %v5063_v52 = vsub.f32 %v114_v21, %v154_v27  ;;  %v237_v53 = vand.u32 4294901760, %v5042_v33  ;;  %v5067_v54 = vsub.f32 %v115_v22, %v157_v28 }
  0x64   :  { %4113 = vmatprep.subr.bf16.mxu0 %v4885_v0  ;;  %v5069_v55 = vpack.c.bf16 %v163_v39, %v160_v34  ;;  %v224_v56 = vsub.f32 %v5032_v24, %v223_v40  ;;  %v231_v57 = vsub.f32 %v5034_v25, %v230_v41  ;;  %v5074_v58 = vsub.f32 %v116_v29, %v160_v34  ;;  %p4856_p2 = pnand %p4855_p1, %p4849_p12 }
  0x65   :  { %v5076_v59 = vsub.f32 %v117_v30, %v163_v39  ;;  %v5078_v60 = vsub.f32 %v118_v32, %v166_v46  ;;  %v212_v61 = vand.u32 4294901760, %v5057_v45  ;;  %v5081_v62 = vpack.c.bf16 %v169_v47, %v166_v46 }
  0x66   :  { %v5083_v63 = vsub.f32 %v119_v35, %v169_v47  ;;  %v5085_v2 = vpack.c.bf16 %v175_v49, %v172_v48  ;;  %v5087_v3 = vsub.f32 %v120_v36, %v172_v48  ;;  %v5089_v4 = vsub.f32 %v121_v37, %v175_v49 }
  0x67   :  { %4115 = vmatpush3.bf16.msra.mxu0 %v5029_v18  ;;  %v238_v5 = vsub.f32 %v5042_v33, %v237_v53  ;;  %v244_v6 = vand.u32 4294901760, %v5049_v42  ;;  %v251_v7 = vand.u32 4294901760, %v5051_v43  ;;  %v225_v8 = vand.u32 4294901760, %v224_v56 }
  0x68   :  { %4116 = vmatprep.subr.bf16.mxu0 %v4885_v0  ;;  %v232_v9 = vand.u32 4294901760, %v231_v57  ;;  %v258_v10 = vand.u32 4294901760, %v5053_v44  ;;  %v265_v11 = vand.u32 4294901760, %v5059_v50  ;;  %v213_v14 = vsub.f32 %v5057_v45, %v212_v61 }
  0x69   :  { %v272_v15 = vand.u32 4294901760, %v5061_v51  ;;  %v279_v16 = vand.u32 4294901760, %v5063_v52  ;;  %v286_v17 = vand.u32 4294901760, %v5067_v54  ;;  %v293_v19 = vand.u32 4294901760, %v5074_v58 }
  0x6a   :  { %v300_v20 = vand.u32 4294901760, %v5076_v59  ;;  %v307_v21 = vand.u32 4294901760, %v5078_v60  ;;  %v314_v22 = vand.u32 4294901760, %v5083_v63  ;;  %v321_v23 = vand.u32 4294901760, %v5087_v3 }
  0x6b   :  { %4118 = vmatpush3.bf16.msra.mxu0 %v5037_v26  ;;  %v328_v27 = vand.u32 4294901760, %v5089_v4  ;;  %v5110_v28 = vpack.c.bf16 %v230_v41, %v223_v40  ;;  %v5112_v29 = vpack.c.bf16 %v244_v6, %v237_v53  ;;  %v245_v30 = vsub.f32 %v5049_v42, %v244_v6 }
  0x6c   :  { %4119 = vmatprep.subr.bf16.mxu0 %v4885_v0  ;;  %v5116_v32 = vpack.c.bf16 %v258_v10, %v251_v7  ;;  %v5118_v34 = vpack.c.bf16 %v272_v15, %v265_v11  ;;  %v5120_v35 = vpack.c.bf16 %v286_v17, %v279_v16  ;;  %v5123_v36 = vpack.c.bf16 %v300_v20, %v293_v19 }
  0x6d   :  { %v5125_v37 = vpack.c.bf16 %v314_v22, %v307_v21  ;;  %v5127_v39 = vpack.c.bf16 %v328_v27, %v321_v23  ;;  %v214_v40 = vand.u32 4294901760, %v213_v14  ;;  %v239_v41 = vand.u32 4294901760, %v238_v5 }
  0x6e   :  { %v4132_v46 = vpack.c.bf16 %v232_v9, %v225_v8  ;;  %v246_v47 = vand.u32 4294901760, %v245_v30  ;;  %v252_v48 = vsub.f32 %v5051_v43, %v251_v7  ;;  %v259_v49 = vsub.f32 %v5053_v44, %v258_v10 }
  0x6f   :  { %4121 = vmatpush3.bf16.msra.mxu0 %v5045_v38  ;;  %v266_v53 = vsub.f32 %v5059_v50, %v265_v11  ;;  %v273_v14 = vsub.f32 %v5061_v51, %v272_v15  ;;  %v280_v5 = vsub.f32 %v5063_v52, %v279_v16  ;;  %v287_v10 = vsub.f32 %v5067_v54, %v286_v17 }
  0x70   :  { %4122 = vmatprep.subr.bf16.mxu0 %v4885_v0  ;;  %v4135_v56 = vpack.c.bf16 %v246_v47, %v239_v41  ;;  %v253_v57 = vand.u32 4294901760, %v252_v48  ;;  %v260_v6 = vand.u32 4294901760, %v259_v49  ;;  %v294_v15 = vsub.f32 %v5074_v58, %v293_v19 }
  0x71   :  { %v267_v8 = vand.u32 4294901760, %v266_v53  ;;  %v274_v9 = vand.u32 4294901760, %v273_v14  ;;  %v281_v11 = vand.u32 4294901760, %v280_v5  ;;  %v301_v41 = vsub.f32 %v5076_v59, %v300_v20  ;;  %v799_v5 = vld [vmem:[#allocation9 + $0x10] sm:$0xff] }
  0x72   :  { %v4138_v7 = vpack.c.bf16 %v260_v6, %v253_v57  ;;  %v308_v16 = vsub.f32 %v5078_v60, %v307_v21  ;;  %v295_v47 = vand.u32 4294901760, %v294_v15  ;;  %v315_v17 = vsub.f32 %v5083_v63, %v314_v22 }
  0x73   :  { %4124 = vmatpush3.bf16.msra.mxu0 %v5069_v55  ;;  %v4141_v30 = vpack.c.bf16 %v274_v9, %v267_v8  ;;  %v302_v48 = vand.u32 4294901760, %v301_v41  ;;  %v322_v19 = vsub.f32 %v5087_v3, %v321_v23  ;;  %v329_v20 = vsub.f32 %v5089_v4, %v328_v27  ;;  %v797_v23 = vld [vmem:[#allocation9] sm:$0xff]  ;;  %v798_v27 = vld [vmem:[#allocation9 + $0x8] sm:$0xff]  ;;  %v803_v41 = vld [vmem:[#allocation9 + $0x30] sm:$0xff] }
  0x74   :  { %4125 = vmatprep.subr.bf16.mxu0 %v4885_v0  ;;  %v309_v49 = vand.u32 4294901760, %v308_v16  ;;  %v4156_v14 = vpack.c.bf16 %v5034_v25, %v5032_v24  ;;  %v821_v8 = vand.u32 4294901760, %v797_v23  ;;  %v824_v9 = vand.u32 4294901760, %v798_v27  ;;  %v802_v24 = vld [vmem:[#allocation9 + $0x28] sm:$0xff]  ;;  %v804_v16 = vld [vmem:[#allocation9 + $0x38] sm:$0xff] }
  0x75   :  { %v4147_v53 = vpack.c.bf16 %v302_v48, %v295_v47  ;;  %v323_v57 = vand.u32 4294901760, %v322_v19  ;;  %v330_v6 = vand.u32 4294901760, %v329_v20  ;;  %v836_v15 = vand.u32 4294901760, %v802_v24 }
  0x76   :  { %v5163_v47 = vsub.f32 %v797_v23, %v821_v8  ;;  %v4162_v48 = vpack.c.bf16 %v5053_v44, %v5051_v43  ;;  %v839_v19 = vand.u32 4294901760, %v803_v41  ;;  %v842_v20 = vand.u32 4294901760, %v804_v16 }
  0x77   :  { %4127 = vmatpush3.bf16.msra.mxu0 %v5081_v62  ;;  %v4153_v22 = vpack.c.bf16 %v330_v6, %v323_v57  ;;  %v4165_v44 = vpack.c.bf16 %v5061_v51, %v5059_v50  ;;  %v4168_v6 = vpack.c.bf16 %v5067_v54, %v5063_v52  ;;  %v4171_v50 = vpack.c.bf16 %v5076_v59, %v5074_v58  ;;  %v808_v54 = vld [vmem:[#allocation9 + $0x58] sm:$0xff] }
  0x78   :  { %4128 = vmatprep.subr.bf16.mxu0 %v4885_v0  ;;  %v5184_v43 = vsub.f32 %v804_v16, %v842_v20  ;;  %v4174_v51 = vpack.c.bf16 %v5083_v63, %v5078_v60  ;;  %v4177_v52 = vpack.c.bf16 %v5089_v4, %v5087_v3  ;;  %v854_v58 = vand.u32 4294901760, %v808_v54  ;;  %v810_v60 = vld [vmem:[#allocation9 + $0x68] sm:$0xff]  ;;  %v812_v3 = vld [vmem:[#allocation9 + $0x78] sm:$0xff] }
  0x7b   :  { %4130 = vmatpush3.bf16.msra.mxu0 %v5085_v2 }
  0x7c   :  { %4131 = vmatprep.subr.bf16.mxu0 %v4885_v0 }
  0x7e   :  { %3300 = vmatmul.mubr.f32.vlgmr.msra.gmra.mrb[0].mxu0 %v214_v40  ;;  %v288_v40 = vand.u32 4294901760, %v287_v10  ;;  %v800_v10 = vld [vmem:[#allocation9 + $0x18] sm:$0xff] }
  0x7f   :  { %4133 = vmatpush3.bf16.msra.mxu0 %v4132_v46  ;;  %3334 = vmatprep.mubr.msk.f32.mxu0 %vm4886_vm0, %v4887_v1  ;;  %v830_v25 = vand.u32 4294901760, %v800_v10 }
  0x80   :  { %4134 = vmatprep.subr.bf16.mxu0 %v4885_v0  ;;  %v4144_v46 = vpack.c.bf16 %v288_v40, %v281_v11  ;;  %v827_v11 = vand.u32 4294901760, %v799_v5 }
  0x83   :  { %4136 = vmatpush3.bf16.msra.mxu0 %v4135_v56  ;;  %v316_v56 = vand.u32 4294901760, %v315_v17  ;;  %v5171_v17 = vsub.f32 %v800_v10, %v830_v25 }
  0x84   :  { %4137 = vmatprep.subr.bf16.mxu0 %v4885_v0 }
  0x85   :  { %v4150_v21 = vpack.c.bf16 %v316_v56, %v309_v49  ;;  %v5178_v56 = vsub.f32 %v802_v24, %v836_v15  ;;  %v6142_v10 = vand.u32 4294901760, %v5171_v17 }
  0x87   :  { %4139 = vmatpush3.bf16.msra.mxu0 %v4138_v7  ;;  %v4159_v7 = vpack.c.bf16 %v5049_v42, %v5042_v33  ;;  %v5165_v33 = vsub.f32 %v798_v27, %v824_v9  ;;  %v5167_v42 = vsub.f32 %v799_v5, %v827_v11 }
  0x88   :  { %4140 = vmatprep.subr.bf16.mxu0 %v4885_v0 }
  0x8b   :  { %4142 = vmatpush3.bf16.msra.mxu0 %v4141_v30  ;;  %v801_v30 = vld [vmem:[#allocation9 + $0x20] sm:$0xff] }
  0x8c   :  { %4143 = vmatprep.subr.bf16.mxu0 %v4885_v0  ;;  %v833_v40 = vand.u32 4294901760, %v801_v30 }
  0x8e   :  { %v5173_v49 = vsub.f32 %v801_v30, %v833_v40  ;;  %v5189_v57 = vpack.c.bf16 %v836_v15, %v833_v40 }
  0x8f   :  { %4145 = vmatpush3.bf16.msra.mxu0 %v4144_v46  ;;  %v5161_v46 = vpack.c.bf16 %v824_v9, %v821_v8  ;;  %v928_v9 = vand.u32 4294901760, %v5167_v42 }
  0x90   :  { %4146 = vmatprep.subr.bf16.mxu0 %v4885_v0  ;;  %v6141_v16 = vand.u32 4294901760, %v5173_v49 }
  0x91   :  { %4253 = vmatpush3.bf16.msra.mxu1 %v5161_v46  ;;  %v929_v24 = vsub.f32 %v5167_v42, %v928_v9 }
  0x92   :  { %4254 = vmatprep.subr.bf16.mxu1 %v4885_v0 }
  0x93   :  { %4148 = vmatpush3.bf16.msra.mxu0 %v4147_v53  ;;  %v5176_v53 = vpack.c.bf16 %v830_v25, %v827_v11  ;;  %v936_v25 = vsub.f32 %v5171_v17, %v6142_v10  ;;  %v930_v15 = vand.u32 4294901760, %v929_v24 }
  0x94   :  { %4149 = vmatprep.subr.bf16.mxu0 %v4885_v0 }
  0x95   :  { %4256 = vmatpush3.bf16.msra.mxu1 %v5176_v53 }
  0x96   :  { %4257 = vmatprep.subr.bf16.mxu1 %v4885_v0 }
  0x97   :  { %4151 = vmatpush3.bf16.msra.mxu0 %v4150_v21  ;;  %v5182_v21 = vsub.f32 %v803_v41, %v839_v19  ;;  %v937_v41 = vand.u32 4294901760, %v936_v25 }
  0x98   :  { %4152 = vmatprep.subr.bf16.mxu0 %v4885_v0 }
  0x99   :  { %4259 = vmatpush3.bf16.msra.mxu1 %v5189_v57 }
  0x9a   :  { %4260 = vmatprep.subr.bf16.mxu1 %v4885_v0 }
  0x9b   :  { %4154 = vmatpush3.bf16.msra.mxu0 %v4153_v22  ;;  %v5196_v22 = vpack.c.bf16 %v842_v20, %v839_v19  ;;  %v5325_v19 = vpack.c.bf16 %v937_v41, %v930_v15  ;;  %v943_v20 = vsub.f32 %v5173_v49, %v6141_v16 }
  0x9c   :  { %4155 = vmatprep.subr.bf16.mxu0 %v4885_v0 }
  0x9d   :  { %4262 = vmatpush3.bf16.msra.mxu1 %v5196_v22 }
  0x9e   :  { %3335 = vmatmul.mubr.f32.vlgmr.msra.gmra.mrb[0].mxu0 %v5040_v31  ;;  %4263 = vmatprep.subr.bf16.mxu1 %v4885_v0 }
  0x9f   :  { %4157 = vmatpush3.bf16.msra.mxu0 %v4156_v14  ;;  %3369 = vmatprep.mubr.msk.f32.mxu0 %vm4886_vm0, %v4887_v1  ;;  %v921_v14 = vand.u32 4294901760, %v5165_v33 }
  0xa0   :  { %4158 = vmatprep.subr.bf16.mxu0 %v4885_v0 }
  0xa1   :  { %v922_v8 = vsub.f32 %v5165_v33, %v921_v14 }
  0xa3   :  { %4160 = vmatpush3.bf16.msra.mxu0 %v4159_v7  ;;  %v923_v30 = vand.u32 4294901760, %v922_v8 }
  0xa4   :  { %4161 = vmatprep.subr.bf16.mxu0 %v4885_v0 }
  0xa7   :  { %4163 = vmatpush3.bf16.msra.mxu0 %v4162_v48  ;;  %v6140_v48 = vand.u32 4294901760, %v5178_v56 }
  0xa8   :  { %4164 = vmatprep.subr.bf16.mxu0 %v4885_v0 }
  0xab   :  { %4166 = vmatpush3.bf16.msra.mxu0 %v4165_v44  ;;  %v950_v44 = vsub.f32 %v5178_v56, %v6140_v48 }
  0xac   :  { %4167 = vmatprep.subr.bf16.mxu0 %v4885_v0 }
  0xaf   :  { %4169 = vmatpush3.bf16.msra.mxu0 %v4168_v6  ;;  %v944_v6 = vand.u32 4294901760, %v943_v20 }
  0xb0   :  { %4170 = vmatprep.subr.bf16.mxu0 %v4885_v0 }
  0xb3   :  { %4172 = vmatpush3.bf16.msra.mxu0 %v4171_v50  ;;  %v951_v50 = vand.u32 4294901760, %v950_v44 }
  0xb4   :  { %4173 = vmatprep.subr.bf16.mxu0 %v4885_v0 }
  0xb7   :  { %4175 = vmatpush3.bf16.msra.mxu0 %v4174_v51  ;;  %v6139_v51 = vand.u32 4294901760, %v5182_v21 }
  0xb8   :  { %4176 = vmatprep.subr.bf16.mxu0 %v4885_v0 }
  0xbb   :  { %4178 = vmatpush3.bf16.msra.mxu0 %v4177_v52  ;;  %v6138_v52 = vand.u32 4294901760, %v5184_v43 }
  0xbc   :  { %4179 = vmatprep.subr.bf16.mxu0 %v4885_v0 }
  0xbe   :  { %3370 = vmatmul.mubr.f32.vlgmr.msra.gmra.mrb[0].mxu0 %v5057_v45  ;;  %v807_v45 = vld [vmem:[#allocation9 + $0x50] sm:$0xff] }
  0xbf   :  { %4181 = vmatpush3.bf16.msra.mxu0 %v5022_v12  ;;  %3404 = vmatprep.mubr.msk.f32.mxu0 %vm4886_vm0, %v4887_v1 }
  0xc0   :  { %4182 = vmatprep.subr.bf16.mxu0 %v4885_v0 }
  0xc3   :  { %4184 = vmatpush3.bf16.msra.mxu0 %v5025_v13 }
  0xc4   :  { %4185 = vmatprep.subr.bf16.mxu0 %v4885_v0 }
  0xc7   :  { %4187 = vmatpush3.bf16.msra.mxu0 %v5029_v18 }
  0xc8   :  { %4188 = vmatprep.subr.bf16.mxu0 %v4885_v0 }
  0xcb   :  { %4190 = vmatpush3.bf16.msra.mxu0 %v5037_v26 }
  0xcc   :  { %4191 = vmatprep.subr.bf16.mxu0 %v4885_v0 }
  0xcf   :  { %4193 = vmatpush3.bf16.msra.mxu0 %v5045_v38 }
  0xd0   :  { %4194 = vmatprep.subr.bf16.mxu0 %v4885_v0 }
  0xd3   :  { %4196 = vmatpush3.bf16.msra.mxu0 %v5069_v55 }
  0xd4   :  { %4197 = vmatprep.subr.bf16.mxu0 %v4885_v0 }
  0xd7   :  { %4199 = vmatpush3.bf16.msra.mxu0 %v5081_v62 }
  0xd8   :  { %4200 = vmatprep.subr.bf16.mxu0 %v4885_v0 }
  0xdb   :  { %4202 = vmatpush3.bf16.msra.mxu0 %v5085_v2 }
  0xdc   :  { %4203 = vmatprep.subr.bf16.mxu0 %v4885_v0 }
  0xde   :  { %3405 = vmatmul.mubr.f32.vlgmr.msra.gmra.mrb[0].mxu0 %v212_v61 }
  0xdf   :  { %4205 = vmatpush3.bf16.msra.mxu0 %v5110_v28  ;;  %3439 = vmatprep.mubr.msk.f32.mxu0 %vm4886_vm0, %v4887_v1 }
  0xe0   :  { %4206 = vmatprep.subr.bf16.mxu0 %v4885_v0 }
  0xe3   :  { %4208 = vmatpush3.bf16.msra.mxu0 %v5112_v29 }
  0xe4   :  { %4209 = vmatprep.subr.bf16.mxu0 %v4885_v0 }
  0xe7   :  { %4211 = vmatpush3.bf16.msra.mxu0 %v5116_v32  ;;  %v5289_v32 = vsub.f32 %v808_v54, %v854_v58 }
  0xe8   :  { %4212 = vmatprep.subr.bf16.mxu0 %v4885_v0 }
  0xeb   :  { %4214 = vmatpush3.bf16.msra.mxu0 %v5118_v34 }
  0xec   :  { %4215 = vmatprep.subr.bf16.mxu0 %v4885_v0 }
  0xef   :  { %4217 = vmatpush3.bf16.msra.mxu0 %v5120_v35 }
  0xf0   :  { %4218 = vmatprep.subr.bf16.mxu0 %v4885_v0 }
  0xf3   :  { %4220 = vmatpush3.bf16.msra.mxu0 %v5123_v36 }
  0xf4   :  { %4221 = vmatprep.subr.bf16.mxu0 %v4885_v0 }
  0xf7   :  { %4223 = vmatpush3.bf16.msra.mxu0 %v5125_v37  ;;  %v866_v37 = vand.u32 4294901760, %v812_v3 }
  0xf8   :  { %4224 = vmatprep.subr.bf16.mxu0 %v4885_v0 }
  0xf9   :  { %v5303_v5 = vsub.f32 %v812_v3, %v866_v37  ;;  %v6134_v3 = vand.u32 4294901760, %v5289_v32 }
  0xfb   :  { %4226 = vmatpush3.bf16.msra.mxu0 %v5127_v39  ;;  %v914_v39 = vand.u32 4294901760, %v5163_v47 }
  0xfc   :  { %4227 = vmatprep.subr.bf16.mxu0 %v4885_v0 }
  0xfd   :  { %v915_v7 = vsub.f32 %v5163_v47, %v914_v39 }
  0xfe   :  { %3440 = vmatmul.mubr.f32.vlgmr.msra.gmra.mrb[0].mxu0 %v5040_v31 }
  0xff   :  { %4229 = vmatpush3.bf16.msra.mxu0 %v5022_v12  ;;  %3474 = vmatprep.mubr.msk.f32.mxu0 %vm4886_vm0, %v4887_v1  ;;  %v805_v12 = vld [vmem:[#allocation9 + $0x40] sm:$0xff]  ;;  %v916_v11 = vand.u32 4294901760, %v915_v7  ;;  %v992_v7 = vsub.f32 %v5289_v32, %v6134_v3 }
 0x100   :  { %4230 = vmatprep.subr.bf16.mxu0 %v4885_v0 }
 0x101   :  { %v5321_v40 = vpack.c.bf16 %v923_v30, %v916_v11  ;;  %v993_v11 = vand.u32 4294901760, %v992_v7  ;;  %v4309_v7 = vpack.c.bf16 %v5184_v43, %v5182_v21 }
 0x103   :  { %4232 = vmatpush3.bf16.msra.mxu0 %v5025_v13  ;;  %v806_v13 = vld [vmem:[#allocation9 + $0x48] sm:$0xff] }
 0x104   :  { %4233 = vmatprep.subr.bf16.mxu0 %v4885_v0 }
 0x107   :  { %4235 = vmatpush3.bf16.msra.mxu0 %v5029_v18  ;;  %v845_v18 = vand.u32 4294901760, %v805_v12 }
 0x108   :  { %4236 = vmatprep.subr.bf16.mxu0 %v4885_v0 }
 0x109   :  { %v5283_v4 = vsub.f32 %v805_v12, %v845_v18  ;;  %v5335_v12 = vpack.c.bf16 %v951_v50, %v944_v6  ;;  %v6130_v50 = vand.u32 4294901760, %v5303_v5 }
 0x10b   :  { %4238 = vmatpush3.bf16.msra.mxu0 %v5037_v26  ;;  %v848_v26 = vand.u32 4294901760, %v806_v13  ;;  %v6137_v54 = vand.u32 4294901760, %v5283_v4 }
 0x10c   :  { %4239 = vmatprep.subr.bf16.mxu0 %v4885_v0 }
 0x10d   :  { %v5285_v28 = vsub.f32 %v806_v13, %v848_v26  ;;  %v957_v13 = vsub.f32 %v5182_v21, %v6139_v51 }
 0x10f   :  { %4241 = vmatpush3.bf16.msra.mxu0 %v5045_v38  ;;  %v5273_v38 = vpack.c.bf16 %v848_v26, %v845_v18  ;;  %v964_v18 = vsub.f32 %v5184_v43, %v6138_v52  ;;  %v958_v26 = vand.u32 4294901760, %v957_v13 }
 0x110   :  { %4242 = vmatprep.subr.bf16.mxu0 %v4885_v0 }
 0x111   :  { %4265 = vmatpush3.bf16.msra.mxu1 %v5273_v38 }
 0x112   :  { %4266 = vmatprep.subr.bf16.mxu1 %v4885_v0 }
 0x113   :  { %4244 = vmatpush3.bf16.msra.mxu0 %v5069_v55  ;;  %v851_v55 = vand.u32 4294901760, %v807_v45 }
 0x114   :  { %4245 = vmatprep.subr.bf16.mxu0 %v4885_v0 }
 0x115   :  { %v5277_v59 = vpack.c.bf16 %v854_v58, %v851_v55  ;;  %v5287_v29 = vsub.f32 %v807_v45, %v851_v55  ;;  %v965_v45 = vand.u32 4294901760, %v964_v18  ;;  %v6136_v55 = vand.u32 4294901760, %v5285_v28 }
 0x117   :  { %4247 = vmatpush3.bf16.msra.mxu0 %v5081_v62  ;;  %4268 = vmatpush3.bf16.msra.mxu1 %v5277_v59  ;;  %v860_v62 = vand.u32 4294901760, %v810_v60  ;;  %v5345_v58 = vpack.c.bf16 %v965_v45, %v958_v26  ;;  %v1020_v26 = vsub.f32 %v5303_v5, %v6130_v50  ;;  %v778_v50 = vstv %s102_s24 }
 0x118   :  { %4248 = vmatprep.subr.bf16.mxu0 %v4885_v0  ;;  %4269 = vmatprep.subr.bf16.mxu1 %v4885_v0 }
 0x119   :  { %v5294_v35 = vsub.f32 %v810_v60, %v860_v62  ;;  %v978_v60 = vsub.f32 %v5285_v28, %v6136_v55 }
 0x11b   :  { %4250 = vmatpush3.bf16.msra.mxu0 %v5085_v2  ;;  %v811_v2 = vld [vmem:[#allocation9 + $0x70] sm:$0xff]  ;;  %v6132_v24 = vand.u32 4294901760, %v5294_v35 }
 0x11c   :  { %4395 = vmatprep.subr.bf16.mxu0 %v4885_v0  ;;  %v863_v36 = vand.u32 4294901760, %v811_v2 }
 0x11d   :  { %v1006_v41 = vsub.f32 %v5294_v35, %v6132_v24 }
 0x11e   :  { %3475 = vmatmul.mubr.f32.vlgmr.msra.gmra.mrb[0].mxu0 %v5040_v31  ;;  %v809_v31 = vld [vmem:[#allocation9 + $0x60] sm:$0xff]  ;;  %v5299_v23 = vpack.c.bf16 %v866_v37, %v863_v36  ;;  %v5301_v27 = vsub.f32 %v811_v2, %v863_v36  ;;  %v6135_v2 = vand.u32 4294901760, %v5287_v29 }
 0x11f   :  { %3719 = vmatprep.mubr.msk.f32.mxu0 %vm4886_vm0, %v4887_v1  ;;  %v857_v61 = vand.u32 4294901760, %v809_v31  ;;  %v1007_v44 = vand.u32 4294901760, %v1006_v41 }
 0x120   :  { %v985_v37 = vsub.f32 %v5287_v29, %v6135_v2  ;;  %v6131_v6 = vand.u32 4294901760, %v5301_v27 }
 0x121   :  { %v5281_v63 = vpack.c.bf16 %v860_v62, %v857_v61  ;;  %v5292_v34 = vsub.f32 %v809_v31, %v857_v61  ;;  %v971_v31 = vsub.f32 %v5283_v4, %v6137_v54  ;;  %v979_v62 = vand.u32 4294901760, %v978_v60 }
 0x122   :  { %v986_v8 = vand.u32 4294901760, %v985_v37  ;;  %v1013_v18 = vsub.f32 %v5301_v27, %v6131_v6  ;;  %v4306_v37 = vpack.c.bf16 %v5178_v56, %v5173_v49 }
 0x123   :  { %4271 = vmatpush3.bf16.msra.mxu1 %v5281_v63  ;;  %v972_v61 = vand.u32 4294901760, %v971_v31  ;;  %v6133_v30 = vand.u32 4294901760, %v5292_v34  ;;  %v1021_v31 = vand.u32 4294901760, %v1020_v26  ;;  %v4318_v41 = vpack.c.bf16 %v5294_v35, %v5292_v34 }
 0x124   :  { %4272 = vmatprep.subr.bf16.mxu1 %v4885_v0  ;;  %v5365_v25 = vpack.c.bf16 %v993_v11, %v986_v8  ;;  %v1014_v45 = vand.u32 4294901760, %v1013_v18  ;;  %v4312_v8 = vpack.c.bf16 %v5285_v28, %v5283_v4  ;;  %v4315_v11 = vpack.c.bf16 %v5289_v32, %v5287_v29 }
 0x125   :  { %v5355_v36 = vpack.c.bf16 %v979_v62, %v972_v61  ;;  %v999_v15 = vsub.f32 %v5292_v34, %v6133_v30  ;;  %v4300_v61 = vpack.c.bf16 %v5165_v33, %v5163_v47  ;;  %v4303_v62 = vpack.c.bf16 %v5171_v17, %v5167_v42 }
 0x126   :  { %v4297_v60 = vpack.c.bf16 %v1021_v31, %v1014_v45  ;;  %v4321_v18 = vpack.c.bf16 %v5303_v5, %v5301_v27  ;;  %v6169_v47 = vand.u32 4294901760, %v5173_v49  ;;  %v6170_v33 = vand.u32 4294901760, %v5178_v56 }
 0x127   :  { %4274 = vmatpush3.bf16.msra.mxu1 %v5299_v23  ;;  %v1000_v20 = vand.u32 4294901760, %v999_v15  ;;  %v771_v15 = vlaneseq  ;;  %v6172_v42 = vand.u32 4294901760, %v5184_v43  ;;  %v6175_v49 = vand.u32 4294901760, %v5287_v29  ;;  %v1490_v29 = vld [vmem:[#allocation10 + $0x58] sm:$0xff] }
 0x128   :  { %4275 = vmatprep.subr.bf16.mxu1 %v4885_v0  ;;  %v6176_v56 = vand.u32 4294901760, %v5289_v32  ;;  %v6178_v43 = vand.u32 4294901760, %v5294_v35  ;;  %v1536_v32 = vand.u32 4294901760, %v1490_v29  ;;  %v1491_v35 = vld [vmem:[#allocation10 + $0x60] sm:$0xff] }
 0x129   :  { %v4294_v13 = vpack.c.bf16 %v1007_v44, %v1000_v20  ;;  %v772_v20 = vshrl.u32 %v771_v15, 7  ;;  %v774_v44 = vand.u32 127, %v771_v15 }
 0x12b   :  { %v775_v26 = vmul.u32 2654435761, %v772_v20  ;;  %v776_v45 = vmul.u32 2246822519, %v774_v44  ;;  %v2843_v20 = vld [vmem:[%s6122_s3] ss:$0 sm:$0xff] }
 0x12d   :  { %v777_v31 = vadd.s32 %v776_v45, %v775_v26 }
 0x12f   :  { %v5400_v6 = vadd.s32 %v778_v50, %v777_v31 }
 0x131   :  { %v780_v24 = vadd.s32 2654435761, %v5400_v6 }
 0x133   :  { %v2844_v30 = vshrl.u32 %v780_v24, 16 }
 0x135   :  { %v783_v3 = vxor.u32 %v2844_v30, %v780_v24 }
 0x137   :  { %v784_v2 = vmul.u32 2146121005, %v783_v3 }
 0x139   :  { %v2845_v55 = vshrl.u32 %v784_v2, 15 }
 0x13b   :  { %v787_v15 = vxor.u32 %v2845_v55, %v784_v2  ;;  %v1483_v2 = vld [vmem:[#allocation10 + $0x20] sm:$0xff] }
 0x13c   :  { %v1515_v24 = vand.u32 4294901760, %v1483_v2 }
 0x13d   :  { %v788_v54 = vmul.u32 2221713035, %v787_v15 }
 0x13f   :  { %v2846_v52 = vshrl.u32 %v788_v54, 16 }
 0x141   :  { %v791_v51 = vxor.u32 %v2846_v52, %v788_v54 }
 0x143   :  { %v2847_v48 = vshrl.u32 %v791_v51, 8 }
 0x145   :  { %vm794_vm1 = vcmp.ge.s32.totalorder %v2847_v48, 1677722  ;;  %v1481_v48 = vld [vmem:[#allocation10 + $0x10] sm:$0xff] }
 0x1f1   :  { %v766_v44 = vpop.f32.mrb[0].mxu0 }
 0x1f2   :  { %v4683_v26 = vadd.f32 %v2843_v20, %v766_v44  ;;  %v3476_v45 = vpop.f32.mrb[1].mxu0 }
 0x1f3   :  { %v5445_v45 = vsub.f32 %v1483_v2, %v1515_v24 }
 0x1f4   :  { %v770_v50 = vmax.f32 %v4683_v26, 0.0 }
 0x1f6   :  { %v795_v31 = vmul.f32 1.1111112, %v770_v50 }
 0x1f8   :  { %v796_v16 = vsel %vm794_vm1, %v795_v31, 0.0 }
 0x1f9   :  { %v5406_v10 = vand.u32 4294901760, %v796_v16 }
 0x1fb   :  { %v5409_v3 = vsub.f32 %v796_v16, %v5406_v10  ;;  %v1480_v16 = vld [vmem:[#allocation10 + $0x8] sm:$0xff] }
 0x1fc   :  { %v1506_v51 = vand.u32 4294901760, %v1480_v16 }
 0x1fd   :  { %v903_v55 = vand.u32 4294901760, %v5409_v3 }
 0x1ff   :  { %v904_v52 = vsub.f32 %v5409_v3, %v903_v55 }
 0x201   :  { %v905_v54 = vand.u32 4294901760, %v904_v52 }
 0x203   :  { %3510 = vmatmul.mubr.f32.vlgmr.msra.gmra.mrb[0].mxu1 %v905_v54 }
 0x204   :  { %4277 = vmatpush3.bf16.msra.mxu1 %v5321_v40  ;;  %3544 = vmatprep.mubr.msk.f32.mxu1 %vm4886_vm0, %v4887_v1  ;;  %v1479_v40 = vld [vmem:[#allocation10] sm:$0xff] }
 0x205   :  { %4278 = vmatprep.subr.bf16.mxu1 %v4885_v0 }
 0x208   :  { %4280 = vmatpush3.bf16.msra.mxu1 %v5325_v19  ;;  %v1503_v19 = vand.u32 4294901760, %v1479_v40 }
 0x209   :  { %4281 = vmatprep.subr.bf16.mxu1 %v4885_v0 }
 0x20a   :  { %v5435_v15 = vpack.c.bf16 %v1506_v51, %v1503_v19  ;;  %v5437_v20 = vsub.f32 %v1479_v40, %v1503_v19  ;;  %v1493_v19 = vld [vmem:[#allocation10 + $0x70] sm:$0xff] }
 0x20c   :  { %4283 = vmatpush3.bf16.msra.mxu1 %v5335_v12  ;;  %v1482_v12 = vld [vmem:[#allocation10 + $0x18] sm:$0xff]  ;;  %4397 = vmatpush3.bf16.msra.mxu0 %v5435_v15  ;;  %v1596_v2 = vand.u32 4294901760, %v5437_v20 }
 0x20d   :  { %4284 = vmatprep.subr.bf16.mxu1 %v4885_v0  ;;  %v1512_v30 = vand.u32 4294901760, %v1482_v12  ;;  %4398 = vmatprep.subr.bf16.mxu0 %v4885_v0 }
 0x20f   :  { %v5443_v26 = vsub.f32 %v1482_v12, %v1512_v30  ;;  %v1545_v12 = vand.u32 4294901760, %v1493_v19 }
 0x210   :  { %4286 = vmatpush3.bf16.msra.mxu1 %v5345_v58  ;;  %v1509_v58 = vand.u32 4294901760, %v1481_v48 }
 0x211   :  { %4287 = vmatprep.subr.bf16.mxu1 %v4885_v0 }
 0x212   :  { %v5441_v44 = vsub.f32 %v1481_v48, %v1509_v58  ;;  %v5451_v50 = vpack.c.bf16 %v1512_v30, %v1509_v58 }
 0x214   :  { %4289 = vmatpush3.bf16.msra.mxu1 %v5355_v36  ;;  %v1484_v36 = vld [vmem:[#allocation10 + $0x28] sm:$0xff]  ;;  %4400 = vmatpush3.bf16.msra.mxu0 %v5451_v50 }
 0x215   :  { %4290 = vmatprep.subr.bf16.mxu1 %v4885_v0  ;;  %4401 = vmatprep.subr.bf16.mxu0 %v4885_v0 }
 0x218   :  { %4292 = vmatpush3.bf16.msra.mxu1 %v5365_v25  ;;  %v1518_v25 = vand.u32 4294901760, %v1484_v36 }
 0x219   :  { %4293 = vmatprep.subr.bf16.mxu1 %v4885_v0 }
 0x21a   :  { %v5453_v31 = vsub.f32 %v1484_v36, %v1518_v25 }
 0x21c   :  { %4295 = vmatpush3.bf16.msra.mxu1 %v4294_v13  ;;  %v1485_v13 = vld [vmem:[#allocation10 + $0x30] sm:$0xff] }
 0x21d   :  { %4296 = vmatprep.subr.bf16.mxu1 %v4885_v0  ;;  %v1521_v52 = vand.u32 4294901760, %v1485_v13 }
 0x21f   :  { %v5457_v40 = vsub.f32 %v1485_v13, %v1521_v52  ;;  %v5600_v13 = vsub.f32 %v1490_v29, %v1536_v32 }
 0x220   :  { %4298 = vmatpush3.bf16.msra.mxu1 %v4297_v60  ;;  %v1486_v60 = vld [vmem:[#allocation10 + $0x38] sm:$0xff] }
 0x221   :  { %4299 = vmatprep.subr.bf16.mxu1 %v4885_v0  ;;  %v1524_v54 = vand.u32 4294901760, %v1486_v60 }
 0x223   :  { %3545 = vmatmul.mubr.f32.vlgmr.msra.gmra.mrb[0].mxu1 %v5406_v10  ;;  %v5473_v48 = vpack.c.bf16 %v1524_v54, %v1521_v52 }
 0x224   :  { %4301 = vmatpush3.bf16.msra.mxu1 %v4300_v61  ;;  %3579 = vmatprep.mubr.msk.f32.mxu1 %vm4886_vm0, %v4887_v1  ;;  %v5439_v61 = vsub.f32 %v1480_v16, %v1506_v51  ;;  %v5459_v16 = vsub.f32 %v1486_v60, %v1524_v54  ;;  %v1494_v51 = vld [vmem:[#allocation10 + $0x78] sm:$0xff] }
 0x225   :  { %4302 = vmatprep.subr.bf16.mxu1 %v4885_v0  ;;  %v1548_v58 = vand.u32 4294901760, %v1494_v51 }
 0x226   :  { %v1603_v36 = vand.u32 4294901760, %v5439_v61 }
 0x227   :  { %v5606_v54 = vpack.c.bf16 %v1548_v58, %v1545_v12 }
 0x228   :  { %4304 = vmatpush3.bf16.msra.mxu1 %v4303_v62  ;;  %v5465_v62 = vpack.c.bf16 %v1518_v25, %v1515_v24 }
 0x229   :  { %4305 = vmatprep.subr.bf16.mxu1 %v4885_v0 }
 0x22a   :  { %4403 = vmatpush3.bf16.msra.mxu0 %v5465_v62 }
 0x22b   :  { %4404 = vmatprep.subr.bf16.mxu0 %v4885_v0 }
 0x22c   :  { %4307 = vmatpush3.bf16.msra.mxu1 %v4306_v37  ;;  %v4348_v37 = vpack.c.bf16 %v921_v14, %v914_v39  ;;  %v4354_v39 = vpack.c.bf16 %v6170_v33, %v6169_v47  ;;  %v6171_v14 = vand.u32 4294901760, %v5182_v21  ;;  %v6177_v21 = vand.u32 4294901760, %v5292_v34 }
 0x22d   :  { %4308 = vmatprep.subr.bf16.mxu1 %v4885_v0  ;;  %v1604_v47 = vsub.f32 %v5439_v61, %v1603_v36  ;;  %v1610_v33 = vand.u32 4294901760, %v5441_v44 }
 0x22e   :  { %4406 = vmatpush3.bf16.msra.mxu0 %v5473_v48 }
 0x22f   :  { %4407 = vmatprep.subr.bf16.mxu0 %v4885_v0 }
 0x230   :  { %4310 = vmatpush3.bf16.msra.mxu1 %v4309_v7  ;;  %v6168_v7 = vand.u32 4294901760, %v5171_v17  ;;  %v4357_v17 = vpack.c.bf16 %v6172_v42, %v6171_v14  ;;  %v1605_v42 = vand.u32 4294901760, %v1604_v47 }
 0x231   :  { %4311 = vmatprep.subr.bf16.mxu1 %v4885_v0 }
 0x234   :  { %4313 = vmatpush3.bf16.msra.mxu1 %v4312_v8  ;;  %v4351_v8 = vpack.c.bf16 %v6168_v7, %v928_v9  ;;  %v6173_v9 = vand.u32 4294901760, %v5283_v4  ;;  %v6179_v4 = vand.u32 4294901760, %v5301_v27  ;;  %v1539_v27 = vand.u32 4294901760, %v1491_v35 }
 0x235   :  { %4314 = vmatprep.subr.bf16.mxu1 %v4885_v0  ;;  %v5610_v7 = vsub.f32 %v1494_v51, %v1548_v58 }
 0x236   :  { %v5602_v60 = vsub.f32 %v1491_v35, %v1539_v27 }
 0x238   :  { %4316 = vmatpush3.bf16.msra.mxu1 %v4315_v11  ;;  %v6174_v11 = vand.u32 4294901760, %v5285_v28  ;;  %v6180_v28 = vand.u32 4294901760, %v5303_v5 }
 0x239   :  { %4317 = vmatprep.subr.bf16.mxu1 %v4885_v0 }
 0x23c   :  { %4319 = vmatpush3.bf16.msra.mxu1 %v4318_v41  ;;  %v4360_v41 = vpack.c.bf16 %v6174_v11, %v6173_v9 }
 0x23d   :  { %4320 = vmatprep.subr.bf16.mxu1 %v4885_v0 }
 0x240   :  { %4322 = vmatpush3.bf16.msra.mxu1 %v4321_v18  ;;  %v4363_v18 = vpack.c.bf16 %v6176_v56, %v6175_v49  ;;  %v6154_v56 = vand.u32 4294901760, %v5445_v45 }
 0x241   :  { %4323 = vmatprep.subr.bf16.mxu1 %v4885_v0 }
 0x243   :  { %3580 = vmatmul.mubr.f32.vlgmr.msra.gmra.mrb[0].mxu1 %v5409_v3  ;;  %v4366_v3 = vpack.c.bf16 %v6178_v43, %v6177_v21  ;;  %v1625_v43 = vsub.f32 %v5445_v45, %v6154_v56 }
 0x244   :  { %4325 = vmatpush3.bf16.msra.mxu1 %v5161_v46  ;;  %3614 = vmatprep.mubr.msk.f32.mxu1 %vm4886_vm0, %v4887_v1 }
 0x245   :  { %4326 = vmatprep.subr.bf16.mxu1 %v4885_v0 }
 0x248   :  { %4328 = vmatpush3.bf16.msra.mxu1 %v5176_v53 }
 0x249   :  { %4329 = vmatprep.subr.bf16.mxu1 %v4885_v0 }
 0x24c   :  { %4331 = vmatpush3.bf16.msra.mxu1 %v5189_v57 }
 0x24d   :  { %4332 = vmatprep.subr.bf16.mxu1 %v4885_v0 }
 0x250   :  { %4334 = vmatpush3.bf16.msra.mxu1 %v5196_v22 }
 0x251   :  { %4335 = vmatprep.subr.bf16.mxu1 %v4885_v0 }
 0x254   :  { %4337 = vmatpush3.bf16.msra.mxu1 %v5273_v38 }
 0x255   :  { %4338 = vmatprep.subr.bf16.mxu1 %v4885_v0 }
 0x258   :  { %4340 = vmatpush3.bf16.msra.mxu1 %v5277_v59 }
 0x259   :  { %4341 = vmatprep.subr.bf16.mxu1 %v4885_v0 }
 0x25c   :  { %4343 = vmatpush3.bf16.msra.mxu1 %v5281_v63 }
 0x25d   :  { %4344 = vmatprep.subr.bf16.mxu1 %v4885_v0 }
 0x260   :  { %4346 = vmatpush3.bf16.msra.mxu1 %v5299_v23 }
 0x261   :  { %4347 = vmatprep.subr.bf16.mxu1 %v4885_v0 }
 0x263   :  { %3615 = vmatmul.mubr.f32.vlgmr.msra.gmra.mrb[0].mxu1 %v903_v55  ;;  %v4369_v55 = vpack.c.bf16 %v6180_v28, %v6179_v4  ;;  %v1626_v4 = vand.u32 4294901760, %v1625_v43 }
 0x264   :  { %4349 = vmatpush3.bf16.msra.mxu1 %v4348_v37  ;;  %3649 = vmatprep.mubr.msk.f32.mxu1 %vm4886_vm0, %v4887_v1  ;;  %v5608_v37 = vsub.f32 %v1493_v19, %v1545_v12  ;;  %v6147_v12 = vand.u32 4294901760, %v5600_v13 }
 0x265   :  { %4350 = vmatprep.subr.bf16.mxu1 %v4885_v0 }
 0x266   :  { %v1674_v47 = vsub.f32 %v5600_v13, %v6147_v12  ;;  %v2848_v12 = vld [vmem:[%s6124_s5] ss:$0 sm:$0xff] }
 0x268   :  { %4352 = vmatpush3.bf16.msra.mxu1 %v4351_v8  ;;  %v1597_v8 = vsub.f32 %v5437_v20, %v1596_v2 }
 0x269   :  { %4353 = vmatprep.subr.bf16.mxu1 %v4885_v0 }
 0x26a   :  { %v1598_v14 = vand.u32 4294901760, %v1597_v8 }
 0x26c   :  { %4355 = vmatpush3.bf16.msra.mxu1 %v4354_v39  ;;  %v6155_v39 = vand.u32 4294901760, %v5443_v26  ;;  %v5628_v11 = vpack.c.bf16 %v1605_v42, %v1598_v14  ;;  %v1675_v42 = vand.u32 4294901760, %v1674_v47  ;;  %v4450_v47 = vpack.c.bf16 %v5453_v31, %v5445_v45 }
 0x26d   :  { %4356 = vmatprep.subr.bf16.mxu1 %v4885_v0 }
 0x26e   :  { %v1618_v9 = vsub.f32 %v5443_v26, %v6155_v39 }
 0x270   :  { %4358 = vmatpush3.bf16.msra.mxu1 %v4357_v17  ;;  %v1611_v17 = vsub.f32 %v5441_v44, %v1610_v33  ;;  %v1619_v49 = vand.u32 4294901760, %v1618_v9 }
 0x271   :  { %4359 = vmatprep.subr.bf16.mxu1 %v4885_v0 }
 0x274   :  { %4361 = vmatpush3.bf16.msra.mxu1 %v4360_v41  ;;  %v1612_v41 = vand.u32 4294901760, %v1611_v17  ;;  %v6146_v17 = vand.u32 4294901760, %v5602_v60 }
 0x275   :  { %4362 = vmatprep.subr.bf16.mxu1 %v4885_v0 }
 0x276   :  { %v5632_v21 = vpack.c.bf16 %v1619_v49, %v1612_v41  ;;  %v1681_v49 = vsub.f32 %v5602_v60, %v6146_v17 }
 0x278   :  { %4364 = vmatpush3.bf16.msra.mxu1 %v4363_v18  ;;  %v6153_v18 = vand.u32 4294901760, %v5453_v31 }
 0x279   :  { %4365 = vmatprep.subr.bf16.mxu1 %v4885_v0 }
 0x27c   :  { %4367 = vmatpush3.bf16.msra.mxu1 %v4366_v3  ;;  %v1632_v3 = vsub.f32 %v5453_v31, %v6153_v18 }
 0x27d   :  { %4368 = vmatprep.subr.bf16.mxu1 %v4885_v0 }
 0x27e   :  { %v1633_v28 = vand.u32 4294901760, %v1632_v3  ;;  %v1682_v3 = vand.u32 4294901760, %v1681_v49 }
 0x280   :  { %4370 = vmatpush3.bf16.msra.mxu1 %v4369_v55  ;;  %v6152_v55 = vand.u32 4294901760, %v5457_v40 }
 0x281   :  { %4371 = vmatprep.subr.bf16.mxu1 %v4885_v0 }
 0x283   :  { %3650 = vmatmul.mubr.f32.vlgmr.msra.gmra.mrb[0].mxu1 %v5406_v10 }
 0x284   :  { %4373 = vmatpush3.bf16.msra.mxu1 %v5161_v46  ;;  %3684 = vmatprep.mubr.msk.f32.mxu1 %vm4886_vm0, %v4887_v1  ;;  %v1487_v46 = vld [vmem:[#allocation10 + $0x40] sm:$0xff] }
 0x285   :  { %4374 = vmatprep.subr.bf16.mxu1 %v4885_v0 }
 0x288   :  { %4376 = vmatpush3.bf16.msra.mxu1 %v5176_v53  ;;  %v1488_v53 = vld [vmem:[#allocation10 + $0x48] sm:$0xff] }
 0x289   :  { %4377 = vmatprep.subr.bf16.mxu1 %v4885_v0 }
 0x28c   :  { %4379 = vmatpush3.bf16.msra.mxu1 %v5189_v57  ;;  %v1527_v57 = vand.u32 4294901760, %v1487_v46 }
 0x28d   :  { %4380 = vmatprep.subr.bf16.mxu1 %v4885_v0 }
 0x28e   :  { %v5594_v30 = vsub.f32 %v1487_v46, %v1527_v57  ;;  %v6151_v46 = vand.u32 4294901760, %v5459_v16 }
 0x290   :  { %4382 = vmatpush3.bf16.msra.mxu1 %v5196_v22  ;;  %v1530_v22 = vand.u32 4294901760, %v1488_v53 }
 0x291   :  { %4383 = vmatprep.subr.bf16.mxu1 %v4885_v0 }
 0x292   :  { %v5596_v24 = vsub.f32 %v1488_v53, %v1530_v22  ;;  %v5642_v53 = vpack.c.bf16 %v1633_v28, %v1626_v4  ;;  %v6144_v28 = vand.u32 4294901760, %v5608_v37 }
 0x294   :  { %4385 = vmatpush3.bf16.msra.mxu1 %v5273_v38  ;;  %v5580_v38 = vpack.c.bf16 %v1530_v22, %v1527_v57  ;;  %v1639_v57 = vsub.f32 %v5457_v40, %v6152_v55  ;;  %v1646_v22 = vsub.f32 %v5459_v16, %v6151_v46 }
 0x295   :  { %4386 = vmatprep.subr.bf16.mxu1 %v4885_v0 }
 0x296   :  { %4409 = vmatpush3.bf16.msra.mxu0 %v5580_v38  ;;  %v1647_v29 = vand.u32 4294901760, %v1646_v22 }
 0x297   :  { %4410 = vmatprep.subr.bf16.mxu0 %v4885_v0 }
 0x298   :  { %4388 = vmatpush3.bf16.msra.mxu1 %v5277_v59  ;;  %v1489_v59 = vld [vmem:[#allocation10 + $0x50] sm:$0xff] }
 0x299   :  { %4389 = vmatprep.subr.bf16.mxu1 %v4885_v0 }
 0x29c   :  { %4391 = vmatpush3.bf16.msra.mxu1 %v5281_v63  ;;  %v1533_v63 = vand.u32 4294901760, %v1489_v59 }
 0x29d   :  { %4392 = vmatprep.subr.bf16.mxu1 %v4885_v0 }
 0x29e   :  { %v5584_v34 = vpack.c.bf16 %v1536_v32, %v1533_v63  ;;  %v5598_v25 = vsub.f32 %v1489_v59, %v1533_v63  ;;  %v1640_v59 = vand.u32 4294901760, %v1639_v57  ;;  %v6150_v63 = vand.u32 4294901760, %v5594_v30 }
 0x29f   :  { %v6149_v32 = vand.u32 4294901760, %v5596_v24  ;;  %v6143_v57 = vand.u32 4294901760, %v5610_v7 }
 0x2a0   :  { %4394 = vmatpush3.bf16.msra.mxu1 %v5299_v23  ;;  %v1492_v23 = vld [vmem:[#allocation10 + $0x68] sm:$0xff]  ;;  %4412 = vmatpush3.bf16.msra.mxu0 %v5584_v34  ;;  %v5652_v35 = vpack.c.bf16 %v1647_v29, %v1640_v59  ;;  %v6148_v51 = vand.u32 4294901760, %v5598_v25  ;;  %v1695_v59 = vsub.f32 %v5608_v37, %v6144_v28  ;;  %v4459_v49 = vpack.c.bf16 %v5600_v13, %v5598_v25 }
 0x2a1   :  { %4539 = vmatprep.subr.bf16.mxu1 %v4885_v0  ;;  %v1542_v5 = vand.u32 4294901760, %v1492_v23  ;;  %4413 = vmatprep.subr.bf16.mxu0 %v4885_v0  ;;  %v1702_v29 = vsub.f32 %v5610_v7, %v6143_v57 }
 0x2a2   :  { %v1667_v8 = vsub.f32 %v5598_v25, %v6148_v51 }
 0x2a3   :  { %3685 = vmatmul.mubr.f32.vlgmr.msra.gmra.mrb[0].mxu1 %v5406_v10  ;;  %v5588_v10 = vpack.c.bf16 %v1542_v5, %v1539_v27  ;;  %v5604_v52 = vsub.f32 %v1492_v23, %v1542_v5  ;;  %v1653_v23 = vsub.f32 %v5594_v30, %v6150_v63  ;;  %v1660_v27 = vsub.f32 %v5596_v24, %v6149_v32 }
 0x2a4   :  { %3929 = vmatprep.mubr.msk.f32.mxu1 %vm4886_vm0, %v4887_v1  ;;  %v1668_v14 = vand.u32 4294901760, %v1667_v8  ;;  %v4447_v8 = vpack.c.bf16 %v5443_v26, %v5441_v44  ;;  %v6185_v44 = vand.u32 4294901760, %v5459_v16 }
 0x2a5   :  { %4415 = vmatpush3.bf16.msra.mxu0 %v5588_v10  ;;  %v1654_v5 = vand.u32 4294901760, %v1653_v23  ;;  %v1661_v19 = vand.u32 4294901760, %v1660_v27  ;;  %v6145_v9 = vand.u32 4294901760, %v5604_v52  ;;  %v1696_v23 = vand.u32 4294901760, %v1695_v59 }
 0x2a6   :  { %4416 = vmatprep.subr.bf16.mxu0 %v4885_v0  ;;  %v4435_v41 = vpack.c.bf16 %v1675_v42, %v1668_v14  ;;  %v1703_v27 = vand.u32 4294901760, %v1702_v29  ;;  %v4453_v14 = vpack.c.bf16 %v5459_v16, %v5457_v40  ;;  %v4456_v42 = vpack.c.bf16 %v5596_v24, %v5594_v30 }
 0x2a7   :  { %v4432_v58 = vpack.c.bf16 %v1661_v19, %v1654_v5  ;;  %v1688_v43 = vsub.f32 %v5604_v52, %v6145_v9  ;;  %v4444_v19 = vpack.c.bf16 %v5439_v61, %v5437_v20  ;;  %v6182_v20 = vand.u32 4294901760, %v5445_v45 }
 0x2a8   :  { %v4441_v5 = vpack.c.bf16 %v1703_v27, %v1696_v23  ;;  %v6183_v61 = vand.u32 4294901760, %v5453_v31  ;;  %v6188_v45 = vand.u32 4294901760, %v5598_v25  ;;  %v6189_v31 = vand.u32 4294901760, %v5600_v13  ;;  %v2172_v13 = vld [vmem:[#allocation12 + $0x58] sm:$0xff] }
 0x2a9   :  { %4418 = vmatpush3.bf16.msra.mxu0 %v5606_v54  ;;  %v1689_v4 = vand.u32 4294901760, %v1688_v43  ;;  %v4462_v43 = vpack.c.bf16 %v5604_v52, %v5602_v60  ;;  %v6191_v16 = vand.u32 4294901760, %v5604_v52  ;;  %v2173_v52 = vld [vmem:[#allocation12 + $0x60] sm:$0xff] }
 0x2aa   :  { %4419 = vmatprep.subr.bf16.mxu0 %v4885_v0 }
 0x2ab   :  { %v4438_v22 = vpack.c.bf16 %v1689_v4, %v1682_v3  ;;  %v4465_v3 = vpack.c.bf16 %v5610_v7, %v5608_v37  ;;  %v1462_v4 = vadd.s32 1013904226, %v5400_v6 }
 0x2ad   :  { %v2849_v59 = vshrl.u32 %v1462_v4, 16 }
 0x2af   :  { %v1465_v29 = vxor.u32 %v2849_v59, %v1462_v4 }
 0x2b1   :  { %v1466_v23 = vmul.u32 2146121005, %v1465_v29 }
 0x2b3   :  { %v2850_v27 = vshrl.u32 %v1466_v23, 15 }
 0x2b5   :  { %v1469_v57 = vxor.u32 %v2850_v27, %v1466_v23 }
 0x2b7   :  { %v1470_v28 = vmul.u32 2221713035, %v1469_v57 }
 0x2b9   :  { %v2851_v9 = vshrl.u32 %v1470_v28, 16 }
 0x2bb   :  { %v1473_v17 = vxor.u32 %v2851_v9, %v1470_v28 }
 0x2bd   :  { %v2852_v32 = vshrl.u32 %v1473_v17, 8  ;;  %v2168_v17 = vld [vmem:[#allocation12 + $0x38] sm:$0xff] }
 0x2bf   :  { %vm1476_vm2 = vcmp.ge.s32.totalorder %v2852_v32, 1677722  ;;  %v2166_v32 = vld [vmem:[#allocation12 + $0x28] sm:$0xff] }
 0x376   :  { %v1457_v51 = vpop.f32.mrb[0].mxu1 }
 0x377   :  { %v4684_v63 = vadd.f32 %v2848_v12, %v1457_v51  ;;  %v3686_v46 = vpop.f32.mrb[1].mxu1  ;;  %v2200_v12 = vand.u32 4294901760, %v2166_v32 }
 0x378   :  { %v2164_v46 = vld [vmem:[#allocation12 + $0x18] sm:$0xff] }
 0x379   :  { %v1461_v55 = vmax.f32 %v4684_v63, 0.0  ;;  %v2165_v63 = vld [vmem:[#allocation12 + $0x20] sm:$0xff]  ;;  %v5749_v27 = vsub.f32 %v2166_v32, %v2200_v12 }
 0x37a   :  { %v2197_v51 = vand.u32 4294901760, %v2165_v63 }
 0x37b   :  { %v1477_v18 = vmul.f32 1.1111112, %v1461_v55 }
 0x37c   :  { %v5741_v29 = vsub.f32 %v2165_v63, %v2197_v51 }
 0x37d   :  { %v1478_v56 = vsel %vm1476_vm2, %v1477_v18, 0.0  ;;  %v2163_v18 = vld [vmem:[#allocation12 + $0x10] sm:$0xff] }
 0x37e   :  { %v5704_v39 = vand.u32 4294901760, %v1478_v56 }
 0x380   :  { %v5707_v4 = vsub.f32 %v1478_v56, %v5704_v39  ;;  %v2162_v56 = vld [vmem:[#allocation12 + $0x8] sm:$0xff] }
 0x381   :  { %v2188_v55 = vand.u32 4294901760, %v2162_v56 }
 0x382   :  { %v1585_v57 = vand.u32 4294901760, %v5707_v4 }
 0x384   :  { %v1586_v9 = vsub.f32 %v5707_v4, %v1585_v57 }
 0x386   :  { %v1587_v28 = vand.u32 4294901760, %v1586_v9 }
 0x388   :  { %3720 = vmatmul.mubr.f32.vlgmr.msra.gmra.mrb[2].mxu0 %v1587_v28  ;;  %v2206_v28 = vand.u32 4294901760, %v2168_v17 }
 0x389   :  { %4421 = vmatpush3.bf16.msra.mxu0 %v5628_v11  ;;  %3754 = vmatprep.mubr.msk.f32.mxu0 %vm4886_vm0, %v4887_v1  ;;  %v2161_v11 = vld [vmem:[#allocation12] sm:$0xff] }
 0x38a   :  { %4422 = vmatprep.subr.bf16.mxu0 %v4885_v0 }
 0x38d   :  { %4424 = vmatpush3.bf16.msra.mxu0 %v5632_v21  ;;  %v2185_v21 = vand.u32 4294901760, %v2161_v11 }
 0x38e   :  { %4425 = vmatprep.subr.bf16.mxu0 %v4885_v0 }
 0x391   :  { %4427 = vmatpush3.bf16.msra.mxu0 %v5642_v53  ;;  %v2191_v53 = vand.u32 4294901760, %v2163_v18 }
 0x392   :  { %4428 = vmatprep.subr.bf16.mxu0 %v4885_v0 }
 0x395   :  { %4430 = vmatpush3.bf16.msra.mxu0 %v5652_v35  ;;  %v2194_v35 = vand.u32 4294901760, %v2164_v46 }
 0x396   :  { %4431 = vmatprep.subr.bf16.mxu0 %v4885_v0 }
 0x397   :  { %v5739_v59 = vsub.f32 %v2164_v46, %v2194_v35  ;;  %v5747_v23 = vpack.c.bf16 %v2194_v35, %v2191_v53 }
 0x399   :  { %4433 = vmatpush3.bf16.msra.mxu0 %v4432_v58  ;;  %v2167_v58 = vld [vmem:[#allocation12 + $0x30] sm:$0xff] }
 0x39a   :  { %4434 = vmatprep.subr.bf16.mxu0 %v4885_v0  ;;  %v2203_v9 = vand.u32 4294901760, %v2167_v58 }
 0x39d   :  { %4436 = vmatpush3.bf16.msra.mxu0 %v4435_v41  ;;  %v5731_v41 = vpack.c.bf16 %v2188_v55, %v2185_v21 }
 0x39e   :  { %4437 = vmatprep.subr.bf16.mxu0 %v4885_v0 }
 0x39f   :  { %4541 = vmatpush3.bf16.msra.mxu1 %v5731_v41 }
 0x3a0   :  { %4542 = vmatprep.subr.bf16.mxu1 %v4885_v0 }
 0x3a1   :  { %4439 = vmatpush3.bf16.msra.mxu0 %v4438_v22  ;;  %v5733_v22 = vsub.f32 %v2161_v11, %v2185_v21  ;;  %v5753_v11 = vsub.f32 %v2167_v58, %v2203_v9  ;;  %v2175_v21 = vld [vmem:[#allocation12 + $0x70] sm:$0xff] }
 0x3a2   :  { %4440 = vmatprep.subr.bf16.mxu0 %v4885_v0  ;;  %v2227_v46 = vand.u32 4294901760, %v2175_v21 }
 0x3a3   :  { %4544 = vmatpush3.bf16.msra.mxu1 %v5747_v23  ;;  %v2278_v63 = vand.u32 4294901760, %v5733_v22 }
 0x3a4   :  { %4545 = vmatprep.subr.bf16.mxu1 %v4885_v0 }
 0x3a5   :  { %4442 = vmatpush3.bf16.msra.mxu0 %v4441_v5  ;;  %v5735_v5 = vsub.f32 %v2162_v56, %v2188_v55  ;;  %v5755_v56 = vsub.f32 %v2168_v17, %v2206_v28  ;;  %v2176_v55 = vld [vmem:[#allocation12 + $0x78] sm:$0xff] }
 0x3a6   :  { %4443 = vmatprep.subr.bf16.mxu0 %v4885_v0 }
 0x3a7   :  { %v2285_v32 = vand.u32 4294901760, %v5735_v5 }
 0x3a8   :  { %3755 = vmatmul.mubr.f32.vlgmr.msra.gmra.mrb[2].mxu0 %v5704_v39 }
 0x3a9   :  { %4445 = vmatpush3.bf16.msra.mxu0 %v4444_v19  ;;  %3789 = vmatprep.mubr.msk.f32.mxu0 %vm4886_vm0, %v4887_v1  ;;  %v5737_v19 = vsub.f32 %v2163_v18, %v2191_v53  ;;  %v5769_v18 = vpack.c.bf16 %v2206_v28, %v2203_v9  ;;  %v2230_v53 = vand.u32 4294901760, %v2176_v55 }
 0x3aa   :  { %4446 = vmatprep.subr.bf16.mxu0 %v4885_v0 }
 0x3ab   :  { %v5899_v28 = vpack.c.bf16 %v2230_v53, %v2227_v46 }
 0x3ad   :  { %4448 = vmatpush3.bf16.msra.mxu0 %v4447_v8  ;;  %v5761_v8 = vpack.c.bf16 %v2200_v12, %v2197_v51 }
 0x3ae   :  { %4449 = vmatprep.subr.bf16.mxu0 %v4885_v0 }
 0x3af   :  { %4547 = vmatpush3.bf16.msra.mxu1 %v5761_v8 }
 0x3b0   :  { %4548 = vmatprep.subr.bf16.mxu1 %v4885_v0 }
 0x3b1   :  { %4451 = vmatpush3.bf16.msra.mxu0 %v4450_v47  ;;  %v4492_v47 = vpack.c.bf16 %v1603_v36, %v1596_v2  ;;  %v4498_v2 = vpack.c.bf16 %v6183_v61, %v6182_v20  ;;  %v6184_v36 = vand.u32 4294901760, %v5457_v40  ;;  %v6190_v40 = vand.u32 4294901760, %v5602_v60 }
 0x3b2   :  { %4452 = vmatprep.subr.bf16.mxu0 %v4885_v0  ;;  %v2218_v60 = vand.u32 4294901760, %v2172_v13  ;;  %v2286_v20 = vsub.f32 %v5735_v5, %v2285_v32  ;;  %v2292_v61 = vand.u32 4294901760, %v5737_v19 }
 0x3b3   :  { %4550 = vmatpush3.bf16.msra.mxu1 %v5769_v18 }
 0x3b4   :  { %4551 = vmatprep.subr.bf16.mxu1 %v4885_v0  ;;  %v5893_v58 = vsub.f32 %v2172_v13, %v2218_v60 }
 0x3b5   :  { %4454 = vmatpush3.bf16.msra.mxu0 %v4453_v14  ;;  %v6181_v14 = vand.u32 4294901760, %v5443_v26  ;;  %v4501_v26 = vpack.c.bf16 %v6185_v44, %v6184_v36  ;;  %v2287_v44 = vand.u32 4294901760, %v2286_v20 }
 0x3b6   :  { %4455 = vmatprep.subr.bf16.mxu0 %v4885_v0 }
 0x3b9   :  { %4457 = vmatpush3.bf16.msra.mxu0 %v4456_v42  ;;  %v4495_v42 = vpack.c.bf16 %v6181_v14, %v1610_v33  ;;  %v6186_v33 = vand.u32 4294901760, %v5594_v30  ;;  %v6192_v30 = vand.u32 4294901760, %v5608_v37  ;;  %v2221_v37 = vand.u32 4294901760, %v2173_v52 }
 0x3ba   :  { %4458 = vmatprep.subr.bf16.mxu0 %v4885_v0  ;;  %v5903_v14 = vsub.f32 %v2176_v55, %v2230_v53 }
 0x3bb   :  { %v5895_v17 = vsub.f32 %v2173_v52, %v2221_v37 }
 0x3bd   :  { %4460 = vmatpush3.bf16.msra.mxu0 %v4459_v49  ;;  %v6187_v49 = vand.u32 4294901760, %v5596_v24  ;;  %v6193_v24 = vand.u32 4294901760, %v5610_v7 }
 0x3be   :  { %4461 = vmatprep.subr.bf16.mxu0 %v4885_v0 }
 0x3c1   :  { %4463 = vmatpush3.bf16.msra.mxu0 %v4462_v43  ;;  %v4504_v43 = vpack.c.bf16 %v6187_v49, %v6186_v33 }
 0x3c2   :  { %4464 = vmatprep.subr.bf16.mxu0 %v4885_v0 }
 0x3c5   :  { %4466 = vmatpush3.bf16.msra.mxu0 %v4465_v3  ;;  %v4507_v3 = vpack.c.bf16 %v6189_v31, %v6188_v45  ;;  %v6167_v31 = vand.u32 4294901760, %v5741_v29 }
 0x3c6   :  { %4467 = vmatprep.subr.bf16.mxu0 %v4885_v0 }
 0x3c8   :  { %3790 = vmatmul.mubr.f32.vlgmr.msra.gmra.mrb[2].mxu0 %v5707_v4  ;;  %v4510_v4 = vpack.c.bf16 %v6191_v16, %v6190_v40  ;;  %v2307_v16 = vsub.f32 %v5741_v29, %v6167_v31 }
 0x3c9   :  { %4469 = vmatpush3.bf16.msra.mxu0 %v5435_v15  ;;  %3824 = vmatprep.mubr.msk.f32.mxu0 %vm4886_vm0, %v4887_v1 }
 0x3ca   :  { %4470 = vmatprep.subr.bf16.mxu0 %v4885_v0 }
 0x3cd   :  { %4472 = vmatpush3.bf16.msra.mxu0 %v5451_v50 }
 0x3ce   :  { %4473 = vmatprep.subr.bf16.mxu0 %v4885_v0 }
 0x3d1   :  { %4475 = vmatpush3.bf16.msra.mxu0 %v5465_v62 }
 0x3d2   :  { %4476 = vmatprep.subr.bf16.mxu0 %v4885_v0 }
 0x3d5   :  { %4478 = vmatpush3.bf16.msra.mxu0 %v5473_v48 }
 0x3d6   :  { %4479 = vmatprep.subr.bf16.mxu0 %v4885_v0 }
 0x3d9   :  { %4481 = vmatpush3.bf16.msra.mxu0 %v5580_v38 }
 0x3da   :  { %4482 = vmatprep.subr.bf16.mxu0 %v4885_v0 }
 0x3dd   :  { %4484 = vmatpush3.bf16.msra.mxu0 %v5584_v34 }
 0x3de   :  { %4485 = vmatprep.subr.bf16.mxu0 %v4885_v0 }
 0x3e1   :  { %4487 = vmatpush3.bf16.msra.mxu0 %v5588_v10 }
 0x3e2   :  { %4488 = vmatprep.subr.bf16.mxu0 %v4885_v0 }
 0x3e5   :  { %4490 = vmatpush3.bf16.msra.mxu0 %v5606_v54 }
 0x3e6   :  { %4491 = vmatprep.subr.bf16.mxu0 %v4885_v0 }
 0x3e8   :  { %3825 = vmatmul.mubr.f32.vlgmr.msra.gmra.mrb[2].mxu0 %v1585_v57  ;;  %v4513_v57 = vpack.c.bf16 %v6193_v24, %v6192_v30  ;;  %v2308_v30 = vand.u32 4294901760, %v2307_v16 }
 0x3e9   :  { %4493 = vmatpush3.bf16.msra.mxu0 %v4492_v47  ;;  %3859 = vmatprep.mubr.msk.f32.mxu0 %vm4886_vm0, %v4887_v1  ;;  %v5901_v47 = vsub.f32 %v2175_v21, %v2227_v46  ;;  %v6160_v46 = vand.u32 4294901760, %v5893_v58 }
 0x3ea   :  { %4494 = vmatprep.subr.bf16.mxu0 %v4885_v0 }
 0x3eb   :  { %v2356_v20 = vsub.f32 %v5893_v58, %v6160_v46  ;;  %v2853_v46 = vld [vmem:[%s6126_s7] ss:$0 sm:$0xff] }
 0x3ed   :  { %4496 = vmatpush3.bf16.msra.mxu0 %v4495_v42  ;;  %v2279_v42 = vsub.f32 %v5733_v22, %v2278_v63 }
 0x3ee   :  { %4497 = vmatprep.subr.bf16.mxu0 %v4885_v0 }
 0x3ef   :  { %v2280_v36 = vand.u32 4294901760, %v2279_v42 }
 0x3f1   :  { %4499 = vmatpush3.bf16.msra.mxu0 %v4498_v2  ;;  %v2299_v2 = vand.u32 4294901760, %v5739_v59  ;;  %v5921_v49 = vpack.c.bf16 %v2287_v44, %v2280_v36  ;;  %v2357_v44 = vand.u32 4294901760, %v2356_v20  ;;  %v4594_v20 = vpack.c.bf16 %v5749_v27, %v5741_v29 }
 0x3f2   :  { %4500 = vmatprep.subr.bf16.mxu0 %v4885_v0 }
 0x3f3   :  { %v2300_v33 = vsub.f32 %v5739_v59, %v2299_v2 }
 0x3f5   :  { %4502 = vmatpush3.bf16.msra.mxu0 %v4501_v26  ;;  %v2293_v26 = vsub.f32 %v5737_v19, %v2292_v61  ;;  %v2301_v45 = vand.u32 4294901760, %v2300_v33 }
 0x3f6   :  { %4503 = vmatprep.subr.bf16.mxu0 %v4885_v0 }
 0x3f9   :  { %4505 = vmatpush3.bf16.msra.mxu0 %v4504_v43  ;;  %v2294_v43 = vand.u32 4294901760, %v2293_v26  ;;  %v6159_v26 = vand.u32 4294901760, %v5895_v17 }
 0x3fa   :  { %4506 = vmatprep.subr.bf16.mxu0 %v4885_v0 }
 0x3fb   :  { %v5925_v40 = vpack.c.bf16 %v2301_v45, %v2294_v43  ;;  %v2363_v45 = vsub.f32 %v5895_v17, %v6159_v26 }
 0x3fd   :  { %4508 = vmatpush3.bf16.msra.mxu0 %v4507_v3  ;;  %v6166_v3 = vand.u32 4294901760, %v5749_v27 }
 0x3fe   :  { %4509 = vmatprep.subr.bf16.mxu0 %v4885_v0 }
 0x401   :  { %4511 = vmatpush3.bf16.msra.mxu0 %v4510_v4  ;;  %v2314_v4 = vsub.f32 %v5749_v27, %v6166_v3 }
 0x402   :  { %4512 = vmatprep.subr.bf16.mxu0 %v4885_v0 }
 0x403   :  { %v2315_v24 = vand.u32 4294901760, %v2314_v4  ;;  %v2364_v4 = vand.u32 4294901760, %v2363_v45 }
 0x405   :  { %4514 = vmatpush3.bf16.msra.mxu0 %v4513_v57  ;;  %v6165_v57 = vand.u32 4294901760, %v5753_v11 }
 0x406   :  { %4515 = vmatprep.subr.bf16.mxu0 %v4885_v0 }
 0x408   :  { %3860 = vmatmul.mubr.f32.vlgmr.msra.gmra.mrb[2].mxu0 %v5704_v39 }
 0x409   :  { %4517 = vmatpush3.bf16.msra.mxu0 %v5435_v15  ;;  %3894 = vmatprep.mubr.msk.f32.mxu0 %vm4886_vm0, %v4887_v1  ;;  %v2169_v15 = vld [vmem:[#allocation12 + $0x40] sm:$0xff] }
 0x40a   :  { %4518 = vmatprep.subr.bf16.mxu0 %v4885_v0 }
 0x40d   :  { %4520 = vmatpush3.bf16.msra.mxu0 %v5451_v50  ;;  %v2170_v50 = vld [vmem:[#allocation12 + $0x48] sm:$0xff] }
 0x40e   :  { %4521 = vmatprep.subr.bf16.mxu0 %v4885_v0 }
 0x411   :  { %4523 = vmatpush3.bf16.msra.mxu0 %v5465_v62  ;;  %v2209_v62 = vand.u32 4294901760, %v2169_v15 }
 0x412   :  { %4524 = vmatprep.subr.bf16.mxu0 %v4885_v0 }
 0x413   :  { %v5887_v35 = vsub.f32 %v2169_v15, %v2209_v62  ;;  %v6164_v15 = vand.u32 4294901760, %v5755_v56 }
 0x415   :  { %4526 = vmatpush3.bf16.msra.mxu0 %v5473_v48  ;;  %v2212_v48 = vand.u32 4294901760, %v2170_v50 }
 0x416   :  { %4527 = vmatprep.subr.bf16.mxu0 %v4885_v0 }
 0x417   :  { %v5873_v25 = vpack.c.bf16 %v2212_v48, %v2209_v62  ;;  %v5889_v51 = vsub.f32 %v2170_v50, %v2212_v48  ;;  %v5935_v50 = vpack.c.bf16 %v2315_v24, %v2308_v30  ;;  %v2321_v62 = vsub.f32 %v5753_v11, %v6165_v57 }
 0x418   :  { %v2328_v48 = vsub.f32 %v5755_v56, %v6164_v15  ;;  %v6157_v24 = vand.u32 4294901760, %v5901_v47 }
 0x419   :  { %4529 = vmatpush3.bf16.msra.mxu0 %v5580_v38  ;;  %v2171_v38 = vld [vmem:[#allocation12 + $0x50] sm:$0xff]  ;;  %4553 = vmatpush3.bf16.msra.mxu1 %v5873_v25 }
 0x41a   :  { %4530 = vmatprep.subr.bf16.mxu0 %v4885_v0  ;;  %4554 = vmatprep.subr.bf16.mxu1 %v4885_v0  ;;  %v2329_v13 = vand.u32 4294901760, %v2328_v48 }
 0x41d   :  { %4532 = vmatpush3.bf16.msra.mxu0 %v5584_v34  ;;  %v2215_v34 = vand.u32 4294901760, %v2171_v38 }
 0x41e   :  { %4533 = vmatprep.subr.bf16.mxu0 %v4885_v0 }
 0x41f   :  { %v5891_v12 = vsub.f32 %v2171_v38, %v2215_v34  ;;  %v2322_v38 = vand.u32 4294901760, %v2321_v62  ;;  %v6156_v62 = vand.u32 4294901760, %v5903_v14 }
 0x421   :  { %4535 = vmatpush3.bf16.msra.mxu0 %v5588_v10  ;;  %v5877_v10 = vpack.c.bf16 %v2218_v60, %v2215_v34  ;;  %v6163_v34 = vand.u32 4294901760, %v5887_v35  ;;  %v6162_v60 = vand.u32 4294901760, %v5889_v51  ;;  %v5945_v52 = vpack.c.bf16 %v2329_v13, %v2322_v38 }
 0x422   :  { %4536 = vmatprep.subr.bf16.mxu0 %v4885_v0  ;;  %v6161_v55 = vand.u32 4294901760, %v5891_v12  ;;  %v2377_v38 = vsub.f32 %v5901_v47, %v6157_v24  ;;  %v2384_v13 = vsub.f32 %v5903_v14, %v6156_v62  ;;  %v4603_v45 = vpack.c.bf16 %v5893_v58, %v5891_v12 }
 0x423   :  { %4556 = vmatpush3.bf16.msra.mxu1 %v5877_v10 }
 0x424   :  { %4557 = vmatprep.subr.bf16.mxu1 %v4885_v0  ;;  %v2349_v42 = vsub.f32 %v5891_v12, %v6161_v55 }
 0x425   :  { %4538 = vmatpush3.bf16.msra.mxu0 %v5606_v54  ;;  %v2174_v54 = vld [vmem:[#allocation12 + $0x68] sm:$0xff] }
 0x426   :  { %v2224_v7 = vand.u32 4294901760, %v2174_v54  ;;  %v2350_v36 = vand.u32 4294901760, %v2349_v42  ;;  %v4591_v42 = vpack.c.bf16 %v5739_v59, %v5737_v19  ;;  %v6197_v19 = vand.u32 4294901760, %v5755_v56 }
 0x428   :  { %3895 = vmatmul.mubr.f32.vlgmr.msra.gmra.mrb[2].mxu0 %v5704_v39  ;;  %v5881_v39 = vpack.c.bf16 %v2224_v7, %v2221_v37  ;;  %v5897_v9 = vsub.f32 %v2174_v54, %v2224_v7  ;;  %v2335_v54 = vsub.f32 %v5887_v35, %v6163_v34  ;;  %v2342_v37 = vsub.f32 %v5889_v51, %v6162_v60 }
 0x429   :  { %v4579_v43 = vpack.c.bf16 %v2357_v44, %v2350_v36  ;;  %v4597_v36 = vpack.c.bf16 %v5755_v56, %v5753_v11  ;;  %v4600_v44 = vpack.c.bf16 %v5889_v51, %v5887_v35 }
 0x42a   :  { %4559 = vmatpush3.bf16.msra.mxu1 %v5881_v39  ;;  %v2336_v7 = vand.u32 4294901760, %v2335_v54  ;;  %v2343_v21 = vand.u32 4294901760, %v2342_v37  ;;  %v6158_v33 = vand.u32 4294901760, %v5897_v9  ;;  %v2378_v54 = vand.u32 4294901760, %v2377_v38 }
 0x42b   :  { %4560 = vmatprep.subr.bf16.mxu1 %v4885_v0  ;;  %v2385_v37 = vand.u32 4294901760, %v2384_v13  ;;  %v6203_v56 = vand.u32 4294901760, %v5897_v9 }
 0x42c   :  { %v4576_v53 = vpack.c.bf16 %v2343_v21, %v2336_v7  ;;  %v2370_v16 = vsub.f32 %v5897_v9, %v6158_v33  ;;  %v4588_v21 = vpack.c.bf16 %v5735_v5, %v5733_v22  ;;  %v6194_v22 = vand.u32 4294901760, %v5741_v29 }
 0x42d   :  { %v4585_v7 = vpack.c.bf16 %v2385_v37, %v2378_v54  ;;  %v6195_v5 = vand.u32 4294901760, %v5749_v27  ;;  %v6200_v29 = vand.u32 4294901760, %v5891_v12  ;;  %v6201_v27 = vand.u32 4294901760, %v5893_v58 }
 0x42e   :  { %4562 = vmatpush3.bf16.msra.mxu1 %v5899_v28  ;;  %v2371_v30 = vand.u32 4294901760, %v2370_v16  ;;  %v4606_v16 = vpack.c.bf16 %v5897_v9, %v5895_v17 }
 0x42f   :  { %4563 = vmatprep.subr.bf16.mxu1 %v4885_v0 }
 0x430   :  { %v4582_v48 = vpack.c.bf16 %v2371_v30, %v2364_v4  ;;  %v4609_v4 = vpack.c.bf16 %v5903_v14, %v5901_v47  ;;  %v2144_v30 = vadd.s32 3668339987, %v5400_v6 }
 0x432   :  { %v2854_v38 = vshrl.u32 %v2144_v30, 16 }
 0x434   :  { %v2147_v13 = vxor.u32 %v2854_v38, %v2144_v30 }
 0x436   :  { %v2148_v54 = vmul.u32 2146121005, %v2147_v13 }
 0x438   :  { %v2855_v37 = vshrl.u32 %v2148_v54, 15 }
 0x43a   :  { %v2151_v62 = vxor.u32 %v2855_v37, %v2148_v54 }
 0x43c   :  { %v2152_v24 = vmul.u32 2221713035, %v2151_v62 }
 0x43e   :  { %v2856_v33 = vshrl.u32 %v2152_v24, 16 }
 0x440   :  { %v2155_v26 = vxor.u32 %v2856_v33, %v2152_v24 }
 0x442   :  { %v2857_v60 = vshrl.u32 %v2155_v26, 8 }
 0x444   :  { %vm2158_vm3 = vcmp.ge.s32.totalorder %v2857_v60, 1677722 }
 0x4fb   :  { %v2139_v55 = vpop.f32.mrb[2].mxu0 }
 0x4fc   :  { %v4685_v34 = vadd.f32 %v2853_v46, %v2139_v55  ;;  %v3896_v15 = vpop.f32.mrb[3].mxu0 }
 0x4fe   :  { %v2143_v57 = vmax.f32 %v4685_v34, 0.0 }
 0x500   :  { %v2159_v3 = vmul.f32 1.1111112, %v2143_v57  ;;  %v4651_v57 = vpack.c.bf16 %v6201_v27, %v6200_v29 }
 0x502   :  { %v2160_v6 = vsel %vm2158_vm3, %v2159_v3, 0.0  ;;  %v4639_v3 = vpack.c.bf16 %v2299_v2, %v2292_v61  ;;  %v6198_v61 = vand.u32 4294901760, %v5887_v35  ;;  %v6199_v2 = vand.u32 4294901760, %v5889_v51 }
 0x503   :  { %v5997_v31 = vand.u32 4294901760, %v2160_v6  ;;  %v6204_v35 = vand.u32 4294901760, %v5901_v47  ;;  %v6205_v51 = vand.u32 4294901760, %v5903_v14 }
 0x505   :  { %v2266_v30 = vsub.f32 %v2160_v6, %v5997_v31 }
 0x507   :  { %v2267_v38 = vand.u32 4294901760, %v2266_v30 }
 0x509   :  { %v2268_v62 = vsub.f32 %v2266_v30, %v2267_v38 }
 0x50b   :  { %v2269_v13 = vand.u32 4294901760, %v2268_v62 }
 0x50d   :  { %3930 = vmatmul.mubr.f32.vlgmr.msra.gmra.mrb[2].mxu1 %v2269_v13 }
 0x50e   :  { %4565 = vmatpush3.bf16.msra.mxu1 %v5921_v49  ;;  %3964 = vmatprep.mubr.msk.f32.mxu1 %vm4886_vm0, %v4887_v1  ;;  %v4636_v49 = vpack.c.bf16 %v2285_v32, %v2278_v63  ;;  %v4642_v63 = vpack.c.bf16 %v6195_v5, %v6194_v22  ;;  %v6196_v32 = vand.u32 4294901760, %v5753_v11  ;;  %v6202_v11 = vand.u32 4294901760, %v5895_v17 }
 0x50f   :  { %4566 = vmatprep.subr.bf16.mxu1 %v4885_v0 }
 0x510   :  { %v4645_v59 = vpack.c.bf16 %v6197_v19, %v6196_v32  ;;  %v4654_v15 = vpack.c.bf16 %v6203_v56, %v6202_v11 }
 0x512   :  { %4568 = vmatpush3.bf16.msra.mxu1 %v5925_v40  ;;  %v4648_v40 = vpack.c.bf16 %v6199_v2, %v6198_v61 }
 0x513   :  { %4569 = vmatprep.subr.bf16.mxu1 %v4885_v0 }
 0x516   :  { %4571 = vmatpush3.bf16.msra.mxu1 %v5935_v50  ;;  %v4657_v50 = vpack.c.bf16 %v6205_v51, %v6204_v35 }
 0x517   :  { %4572 = vmatprep.subr.bf16.mxu1 %v4885_v0 }
 0x51a   :  { %4574 = vmatpush3.bf16.msra.mxu1 %v5945_v52 }
 0x51b   :  { %4575 = vmatprep.subr.bf16.mxu1 %v4885_v0 }
 0x51e   :  { %4577 = vmatpush3.bf16.msra.mxu1 %v4576_v53 }
 0x51f   :  { %4578 = vmatprep.subr.bf16.mxu1 %v4885_v0 }
 0x522   :  { %4580 = vmatpush3.bf16.msra.mxu1 %v4579_v43 }
 0x523   :  { %4581 = vmatprep.subr.bf16.mxu1 %v4885_v0 }
 0x526   :  { %4583 = vmatpush3.bf16.msra.mxu1 %v4582_v48 }
 0x527   :  { %4584 = vmatprep.subr.bf16.mxu1 %v4885_v0 }
 0x52a   :  { %4586 = vmatpush3.bf16.msra.mxu1 %v4585_v7 }
 0x52b   :  { %4587 = vmatprep.subr.bf16.mxu1 %v4885_v0 }
 0x52d   :  { %3965 = vmatmul.mubr.f32.vlgmr.msra.gmra.mrb[2].mxu1 %v5997_v31 }
 0x52e   :  { %4589 = vmatpush3.bf16.msra.mxu1 %v4588_v21  ;;  %3999 = vmatprep.mubr.msk.f32.mxu1 %vm4886_vm0, %v4887_v1 }
 0x52f   :  { %4590 = vmatprep.subr.bf16.mxu1 %v4885_v0 }
 0x532   :  { %4592 = vmatpush3.bf16.msra.mxu1 %v4591_v42 }
 0x533   :  { %4593 = vmatprep.subr.bf16.mxu1 %v4885_v0 }
 0x536   :  { %4595 = vmatpush3.bf16.msra.mxu1 %v4594_v20 }
 0x537   :  { %4596 = vmatprep.subr.bf16.mxu1 %v4885_v0 }
 0x53a   :  { %4598 = vmatpush3.bf16.msra.mxu1 %v4597_v36 }
 0x53b   :  { %4599 = vmatprep.subr.bf16.mxu1 %v4885_v0 }
 0x53e   :  { %4601 = vmatpush3.bf16.msra.mxu1 %v4600_v44 }
 0x53f   :  { %4602 = vmatprep.subr.bf16.mxu1 %v4885_v0 }
 0x542   :  { %4604 = vmatpush3.bf16.msra.mxu1 %v4603_v45 }
 0x543   :  { %4605 = vmatprep.subr.bf16.mxu1 %v4885_v0 }
 0x546   :  { %4607 = vmatpush3.bf16.msra.mxu1 %v4606_v16 }
 0x547   :  { %4608 = vmatprep.subr.bf16.mxu1 %v4885_v0 }
 0x54a   :  { %4610 = vmatpush3.bf16.msra.mxu1 %v4609_v4 }
 0x54b   :  { %4611 = vmatprep.subr.bf16.mxu1 %v4885_v0 }
 0x54d   :  { %4000 = vmatmul.mubr.f32.vlgmr.msra.gmra.mrb[2].mxu1 %v2266_v30 }
 0x54e   :  { %4613 = vmatpush3.bf16.msra.mxu1 %v5731_v41  ;;  %4034 = vmatprep.mubr.msk.f32.mxu1 %vm4886_vm0, %v4887_v1 }
 0x54f   :  { %4614 = vmatprep.subr.bf16.mxu1 %v4885_v0 }
 0x552   :  { %4616 = vmatpush3.bf16.msra.mxu1 %v5747_v23 }
 0x553   :  { %4617 = vmatprep.subr.bf16.mxu1 %v4885_v0 }
 0x556   :  { %4619 = vmatpush3.bf16.msra.mxu1 %v5761_v8 }
 0x557   :  { %4620 = vmatprep.subr.bf16.mxu1 %v4885_v0 }
 0x55a   :  { %4622 = vmatpush3.bf16.msra.mxu1 %v5769_v18 }
 0x55b   :  { %4623 = vmatprep.subr.bf16.mxu1 %v4885_v0 }
 0x55e   :  { %4625 = vmatpush3.bf16.msra.mxu1 %v5873_v25 }
 0x55f   :  { %4626 = vmatprep.subr.bf16.mxu1 %v4885_v0 }
 0x562   :  { %4628 = vmatpush3.bf16.msra.mxu1 %v5877_v10 }
 0x563   :  { %4629 = vmatprep.subr.bf16.mxu1 %v4885_v0 }
 0x566   :  { %4631 = vmatpush3.bf16.msra.mxu1 %v5881_v39 }
 0x567   :  { %4632 = vmatprep.subr.bf16.mxu1 %v4885_v0 }
 0x56a   :  { %4634 = vmatpush3.bf16.msra.mxu1 %v5899_v28 }
 0x56b   :  { %4635 = vmatprep.subr.bf16.mxu1 %v4885_v0 }
 0x56d   :  { %4035 = vmatmul.mubr.f32.vlgmr.msra.gmra.mrb[2].mxu1 %v2267_v38 }
 0x56e   :  { %4637 = vmatpush3.bf16.msra.mxu1 %v4636_v49  ;;  %4069 = vmatprep.mubr.msk.f32.mxu1 %vm4886_vm0, %v4887_v1 }
 0x56f   :  { %4638 = vmatprep.subr.bf16.mxu1 %v4885_v0 }
 0x572   :  { %4640 = vmatpush3.bf16.msra.mxu1 %v4639_v3 }
 0x573   :  { %4641 = vmatprep.subr.bf16.mxu1 %v4885_v0 }
 0x576   :  { %4643 = vmatpush3.bf16.msra.mxu1 %v4642_v63 }
 0x577   :  { %4644 = vmatprep.subr.bf16.mxu1 %v4885_v0 }
 0x57a   :  { %4646 = vmatpush3.bf16.msra.mxu1 %v4645_v59 }
 0x57b   :  { %4647 = vmatprep.subr.bf16.mxu1 %v4885_v0 }
 0x57e   :  { %4649 = vmatpush3.bf16.msra.mxu1 %v4648_v40 }
 0x57f   :  { %4650 = vmatprep.subr.bf16.mxu1 %v4885_v0 }
 0x582   :  { %4652 = vmatpush3.bf16.msra.mxu1 %v4651_v57 }
 0x583   :  { %4653 = vmatprep.subr.bf16.mxu1 %v4885_v0 }
 0x586   :  { %4655 = vmatpush3.bf16.msra.mxu1 %v4654_v15 }
 0x587   :  { %4656 = vmatprep.subr.bf16.mxu1 %v4885_v0 }
 0x58a   :  { %4658 = vmatpush3.bf16.msra.mxu1 %v4657_v50 }
 0x58b   :  { %4659 = vmatprep.subr.bf16.mxu1 %v4885_v0 }
 0x58d   :  { %4070 = vmatmul.mubr.f32.vlgmr.msra.gmra.mrb[2].mxu1 %v5997_v31 }
 0x58e   :  { %4661 = vmatpush3.bf16.msra.mxu1 %v5731_v41  ;;  %4104 = vmatprep.mubr.msk.f32.mxu1 %vm4886_vm0, %v4887_v1  ;;  %v2858_v1 = vld [vmem:[%s6128_s9] ss:$0 sm:$0xff] }
 0x58f   :  { %4662 = vmatprep.subr.bf16.mxu1 %v4885_v0 }
 0x592   :  { %4664 = vmatpush3.bf16.msra.mxu1 %v5747_v23 }
 0x593   :  { %4665 = vmatprep.subr.bf16.mxu1 %v4885_v0 }
 0x596   :  { %4667 = vmatpush3.bf16.msra.mxu1 %v5761_v8 }
 0x597   :  { %4668 = vmatprep.subr.bf16.mxu1 %v4885_v0 }
 0x59a   :  { %4670 = vmatpush3.bf16.msra.mxu1 %v5769_v18 }
 0x59b   :  { %4671 = vmatprep.subr.bf16.mxu1 %v4885_v0 }
 0x59e   :  { %4673 = vmatpush3.bf16.msra.mxu1 %v5873_v25 }
 0x59f   :  { %4674 = vmatprep.subr.bf16.mxu1 %v4885_v0 }
 0x5a2   :  { %4676 = vmatpush3.bf16.msra.mxu1 %v5877_v10 }
 0x5a3   :  { %4677 = vmatprep.subr.bf16.mxu1 %v4885_v0 }
 0x5a6   :  { %4679 = vmatpush3.bf16.msra.mxu1 %v5881_v39 }
 0x5a7   :  { %4680 = vmatprep.subr.bf16.mxu1 %v4885_v0 }
 0x5aa   :  { %4682 = vmatpush3.bf16.msra.mxu1 %v5899_v28 }
 0x5ad   :  { %4105 = vmatmul.mubr.f32.vlgmr.msra.gmra.mrb[2].mxu1 %v5997_v31 }
 0x680   :  { %v2821_v41 = vpop.f32.mrb[2].mxu1 }
 0x681   :  { %v4686_v23 = vadd.f32 %v2858_v1, %v2821_v41  ;;  %v4106_v8 = vpop.f32.mrb[3].mxu1 }
 0x683   :  { %2825 = vst [vmem:[#allocation13] sm:$0xff] %v4686_v23 }
 0x684   :  { %4859 = shalt.err (!%p4856_p2)
}
 0x685   :  { %s4860_s1 = scalar_lea.hbm %s6129_s10, 128 }
 0x686   :  { %p4861_p3 = scmp.ne.s32.totalorder %s6129_s10, %s4860_s1  ;;  %p4864_p4 = scmp.lt.u32.totalorder %s4860_s1, %s6129_s10 }
 0x688   :  { %p4866_p5 = pnand %p4864_p4, %p4861_p3 }
 0x68a   :  { %4869 = shalt.err (!%p4866_p5)
}
 0x68b   :  { %2835 = dma.vmem_to_hbm [thread:$0]  %s2833_s14, 128, %s6129_s10, [#allocation6]  }
 0x68c   :  { %4876 = dma.done.wait [#allocation6], 128  }
 0x68d   :  { %4877 = vsyncadd [#allocation6], 4294967168 }
 0x68e   :  { %2839 = vsyncpa [#allocation5], 1 }
 0x68f   :  { %2840 = vsyncpa [#allocation8], 1 }
 0x690   :  { %2841 = vsyncpa [#allocation11], 1 }
 0x691   :  { %2842 = vsyncpa [#allocation6], 1 }

</bundles_post_ra>
